<compile_context>
chip_gen: v6e
topology: v6e:2x2x1
jax: 0.10.0
libtpu: 0.0.40
codegen_flags: <defaults>
</compile_context>

<pallas_src>
import jax
import jax.numpy as jnp
from jax.experimental import pallas as pl
from jax.experimental.pallas import tpu as pltpu


def _out(x, k, s):
    return (x - k) // s + 1


# ----------------------------------------------------------------------------
# Fused forward kernel (conv1 -> conv2 -> conv3 -> fc1 -> fc2), one sample/step
# ----------------------------------------------------------------------------
def _make_fused_kernel(PH, PW, OH2, OW2, OH3, OW3):
    """PH, PW: conv1-output phase-grid dims (OH1//2, OW1//2)."""
    L2 = (OH2 - 1) * PW + OW2          # rows carried through conv2 (width-PW raster)
    L3 = (OH3 - 1) * PW + OW3          # rows carried through conv3

    def kernel(p1_ref, w1_ref, b1_ref, w2_ref, b2_ref, w3_ref, b3_ref,
               wf1_ref, bf1_ref, wf2_ref, bf2_ref, o_ref):
        # ---- conv1: one matmul over the pre-built phase-major patch rows ----
        x = p1_ref[0]                                              # (4*PH*PW, 64*C) bf16
        h1 = jnp.dot(x, w1_ref[...], preferred_element_type=jnp.float32)
        h1 = jnp.maximum(h1 + b1_ref[...], 0.0).astype(jnp.bfloat16)   # (4*PH*PW, 32)

        # ---- conv2 (k=4, s=2): 16 shifted matmuls over the 2x2-phase layout ----
        # h1 rows: ((a*2+b)*PH + i)*PW + j  <->  conv1 output (2i+a, 2j+b).
        acc2 = jnp.zeros((L2, 64), jnp.float32)
        for a in range(2):
            for b in range(2):
                base = (a * 2 + b) * (PH * PW)
                for da in range(2):
                    for db in range(2):
                        kh, kw = 2 * da + a, 2 * db + b
                        s = base + da * PW + db
                        wblk = w2_ref[(kh * 4 + kw) * 32:(kh * 4 + kw + 1) * 32, :]
                        acc2 = acc2 + jnp.dot(h1[s:s + L2, :], wblk,
                                              preferred_element_type=jnp.float32)
        # rows q = oh2*PW + ow2 are valid; rows with ow2 >= OW2 are junk & never read.
        h2 = jnp.maximum(acc2 + b2_ref[...], 0.0).astype(jnp.bfloat16)   # (L2, 64)

        # ---- conv3 (k=3, s=1): 9 shifted matmuls ----
        acc3 = jnp.zeros((L3, 64), jnp.float32)
        for kh in range(3):
            for kw in range(3):
                s = kh * PW + kw
                wblk = w3_ref[(kh * 3 + kw) * 64:(kh * 3 + kw + 1) * 64, :]
                acc3 = acc3 + jnp.dot(h2[s:s + L3, :], wblk,
                                      preferred_element_type=jnp.float32)
        h3 = jnp.maximum(acc3 + b3_ref[...], 0.0).astype(jnp.bfloat16)   # (L3, 64)

        # ---- fc1: accumulate over the OH3*OW3 valid spatial rows ----
        # fc1 weight rows were pre-permuted to (h, w, c) order to match.
        acc4 = jnp.zeros((1, 512), jnp.float32)
        for p_idx in range(OH3 * OW3):
            oh3, ow3 = divmod(p_idx, OW3)
            row = oh3 * PW + ow3
            wblk = wf1_ref[p_idx * 64:(p_idx + 1) * 64, :]
            acc4 = acc4 + jnp.dot(h3[row:row + 1, :], wblk,
                                  preferred_element_type=jnp.float32)
        h4 = jnp.maximum(acc4 + bf1_ref[...], 0.0).astype(jnp.bfloat16)  # (1, 512)

        # ---- fc2 (output lane-padded to a multiple of 128) ----
        q = jnp.dot(h4, wf2_ref[...], preferred_element_type=jnp.float32) + bf2_ref[...]
        o_ref[0] = q                                                     # (1, A_pad) f32

    return kernel


# ----------------------------------------------------------------------------
# XLA glue: build conv1's patch matrix (phase-major row order) from raw NCHW
# ----------------------------------------------------------------------------
def _conv1_patches_phase_major(state):
    """state (B,C,H,W) f32 -> (B, 4*PH*PW, 64*C) bf16.

    Row order (a, b, i, j) with conv1 output position (oh, ow) = (2i+a, 2j+b);
    feature order (kh, kw, c).  Fuses with the NCHW->NHWC transpose + bf16 cast."""
    B, C, H, W = state.shape
    OH1, OW1 = _out(H, 8, 4), _out(W, 8, 4)
    assert OH1 % 2 == 0 and OW1 % 2 == 0, "conv1 output H/W must be even"
    x = jnp.transpose(state, (0, 2, 3, 1)).astype(jnp.bfloat16)           # NHWC
    cols = [x[:, kh:kh + 4 * OH1:4, kw:kw + 4 * OW1:4, :]
            for kh in range(8) for kw in range(8)]
    K1 = 64 * C
    p = jnp.concatenate(cols, axis=-1)                                    # (B,OH1,OW1,K1)
    p = p.reshape(B, OH1 // 2, 2, OW1 // 2, 2, K1)
    p = p.transpose(0, 2, 4, 1, 3, 5)                                     # (B,2,2,PH,PW,K1)
    return p.reshape(B, OH1 * OW1, K1), OH1, OW1


# ----------------------------------------------------------------------------
# Parameters: PyTorch-layout init + one-time conversion to kernel layout
# ----------------------------------------------------------------------------
def _uniform(key, shape, fan_in):
    bound = 1.0 / jnp.sqrt(jnp.float32(fan_in))
    return jax.random.uniform(key, shape, jnp.float32, -bound, bound)


def init_params(key, input_shape, num_actions):
    """Parameters in PyTorch layout: OIHW conv weights, (out,in) linear weights."""
    C, H, W = input_shape
    ks = jax.random.split(key, 10)
    p = {}
    p["c1_w"] = _uniform(ks[0], (32, C, 8, 8), C * 8 * 8)
    p["c1_b"] = _uniform(ks[1], (32,), C * 8 * 8)
    p["c2_w"] = _uniform(ks[2], (64, 32, 4, 4), 32 * 4 * 4)
    p["c2_b"] = _uniform(ks[3], (64,), 32 * 4 * 4)
    p["c3_w"] = _uniform(ks[4], (64, 64, 3, 3), 64 * 3 * 3)
    p["c3_b"] = _uniform(ks[5], (64,), 64 * 3 * 3)
    oh = _out(_out(_out(H, 8, 4), 4, 2), 3, 1)
    ow = _out(_out(_out(W, 8, 4), 4, 2), 3, 1)
    F = 64 * oh * ow
    p["fc1_w"] = _uniform(ks[6], (512, F), F)
    p["fc1_b"] = _uniform(ks[7], (512,), F)
    p["fc2_w"] = _uniform(ks[8], (num_actions, 512), 512)
    p["fc2_b"] = _uniform(ks[9], (num_actions,), 512)
    return p


def prepare_params(p, input_shape):
    """One-time offline conversion to the fused-kernel layouts (bf16 operands)."""
    C, H, W = input_shape
    OH1, OW1 = _out(H, 8, 4), _out(W, 8, 4)
    OH2, OW2 = _out(OH1, 4, 2), _out(OW1, 4, 2)
    OH3, OW3 = _out(OH2, 3, 1), _out(OW2, 3, 1)
    F = 64 * OH3 * OW3
    A = p["fc2_w"].shape[0]
    A_pad = ((A + 127) // 128) * 128                      # lane-dense final store

    def conv_w(w):                                        # OIHW -> (kh*kw*Cin, Cout)
        Cout, Cin, kh, kw = w.shape
        return jnp.transpose(w, (2, 3, 1, 0)).reshape(kh * kw * Cin, Cout).astype(jnp.bfloat16)

    # fc1 rows are in PyTorch NCHW-flatten order (c,h,w); permute once to (h,w,c).
    wf1 = p["fc1_w"].T.reshape(64, OH3, OW3, 512).transpose(1, 2, 0, 3).reshape(F, 512)
    wf2 = jnp.zeros((512, A_pad), jnp.float32).at[:, :A].set(p["fc2_w"].T)
    bf2 = jnp.zeros((A_pad,), jnp.float32).at[:A].set(p["fc2_b"])
    return {
        "c1_w": conv_w(p["c1_w"]), "c1_b": p["c1_b"].reshape(1, -1).astype(jnp.float32),
        "c2_w": conv_w(p["c2_w"]), "c2_b": p["c2_b"].reshape(1, -1).astype(jnp.float32),
        "c3_w": conv_w(p["c3_w"]), "c3_b": p["c3_b"].reshape(1, -1).astype(jnp.float32),
        "fc1_w": wf1.astype(jnp.bfloat16), "fc1_b": p["fc1_b"].reshape(1, -1).astype(jnp.float32),
        "fc2_w": wf2.astype(jnp.bfloat16), "fc2_b": bf2.reshape(1, -1),
        "fc2_b_raw": p["fc2_b"],          # unpadded; used only for its static length
    }


# ----------------------------------------------------------------------------
# Forward pass (single fused pallas_call)
# ----------------------------------------------------------------------------
@jax.jit
def double_dqn_forward(prepared, state):
    """state: (B, C, H, W) NCHW float32 -> Q-values (B, num_actions) float32."""
    B = state.shape[0]
    patches, OH1, OW1 = _conv1_patches_phase_major(state)
    PH, PW = OH1 // 2, OW1 // 2
    OH2, OW2 = _out(OH1, 4, 2), _out(OW1, 4, 2)
    OH3, OW3 = _out(OH2, 3, 1), _out(OW2, 3, 1)
    R1, K1 = patches.shape[1], patches.shape[2]
    A_pad = prepared["fc2_w"].shape[1]
    num_actions = prepared["fc2_b_raw"].shape[0]

    weights = (prepared["c1_w"], prepared["c1_b"], prepared["c2_w"], prepared["c2_b"],
               prepared["c3_w"], prepared["c3_b"], prepared["fc1_w"], prepared["fc1_b"],
               prepared["fc2_w"], prepared["fc2_b"])

    def resident(arr):                                     # VMEM-resident, never re-DMA'd
        return pl.BlockSpec(arr.shape, lambda i, _n=arr.ndim: (0,) * _n)

    L2 = (OH2 - 1) * PW + OW2
    L3 = (OH3 - 1) * PW + OW3
    F = 64 * OH3 * OW3
    cost = pl.CostEstimate(
        flops=2 * B * (R1 * K1 * 32 + 16 * L2 * 32 * 64 + 9 * L3 * 64 * 64
                       + F * 512 + 512 * A_pad),
        transcendentals=0,
        bytes_accessed=int(patches.size) * 2
        + sum(int(w.size) * w.dtype.itemsize for w in weights)
        + B * A_pad * 4)

    q_pad = pl.pallas_call(
        _make_fused_kernel(PH, PW, OH2, OW2, OH3, OW3),
        out_shape=jax.ShapeDtypeStruct((B, 1, A_pad), jnp.float32),
        grid=(B,),
        in_specs=[pl.BlockSpec((1, R1, K1), lambda i: (i, 0, 0))]   # per-sample patch rows
                 + [resident(w) for w in weights],
        out_specs=pl.BlockSpec((1, 1, A_pad), lambda i: (i, 0, 0)),
        compiler_params=pltpu.CompilerParams(
            dimension_semantics=("parallel",),            # batch-parallel across TCs (v7x)
            vmem_limit_bytes=32 * 1024 * 1024),           # safe on v5e/v6e/v7x
        cost_estimate=cost,
    )(patches, *weights)
    return q_pad.reshape(B, A_pad)[:, :num_actions]


# ----------------------------------------------------------------------------
# Pure-JAX reference (PyTorch semantics; op_dtype controls matmul operand precision)
# ----------------------------------------------------------------------------
def _ref_forward(params, state, op_dtype=jnp.float32):
    def conv(x, w, b, s):
        y = jax.lax.conv_general_dilated(
            x.astype(op_dtype), w.astype(op_dtype), (s, s), "VALID",
            dimension_numbers=("NCHW", "OIHW", "NCHW"),
            preferred_element_type=jnp.float32)
        return jnp.maximum(y + b[None, :, None, None], 0.0)

    x = conv(state, params["c1_w"], params["c1_b"], 4)
    x = conv(x, params["c2_w"], params["c2_b"], 2)
    x = conv(x, params["c3_w"], params["c3_b"], 1)
    x = x.reshape(x.shape[0], -1)                          # NCHW flatten (PyTorch order)
    h = jnp.dot(x.astype(op_dtype), params["fc1_w"].T.astype(op_dtype),
                preferred_element_type=jnp.float32) + params["fc1_b"]
    h = jnp.maximum(h, 0.0)
    return jnp.dot(h.astype(op_dtype), params["fc2_w"].T.astype(op_dtype),
                   preferred_element_type=jnp.float32) + params["fc2_b"]


if __name__ == "__main__":
    # Small, conv-valid input: spatial 52 -> conv trunk 52 -> 12 -> 5 -> 3, F = 64*3*3 = 576.
    input_shape = (4, 52, 52)
    num_actions = 4
    batch = 2

    key = jax.random.PRNGKey(0)
    pkey, xkey = jax.random.split(key)
    params = init_params(pkey, input_shape, num_actions)
    prepared = prepare_params(params, input_shape)
    state = jax.random.normal(xkey, (batch,) + input_shape, jnp.float32)

    q = double_dqn_forward(prepared, state)
    q = jax.block_until_ready(q)
    assert q.shape == (batch, num_actions)

    # Tight check vs a reference using the same bf16-operand / f32-accumulate policy.
    q_ref_bf16 = _ref_forward(params, state, op_dtype=jnp.bfloat16)
    assert jnp.allclose(q, q_ref_bf16, atol=3e-2, rtol=3e-2), \
        "mismatch vs bf16-operand reference"
    # Loose check vs full-f32 PyTorch-semantics reference (bf16 MXU operand rounding).
    q_ref_f32 = _ref_forward(params, state, op_dtype=jnp.float32)
    assert jnp.allclose(q, q_ref_f32, atol=1.5e-1, rtol=1.5e-1), \
        "mismatch vs f32 reference"

    print("KERNEL_OK")
</pallas_src>

<mosaic_0001>
module attributes {stable_mosaic.version = 11 : i64} {
  func.func @kernel(%arg0: i32, %arg1: memref<1x144x256xbf16, #tpu.memory_space<vmem>>, %arg2: memref<256x32xbf16, #tpu.memory_space<vmem>>, %arg3: memref<1x32xf32, #tpu.memory_space<vmem>>, %arg4: memref<512x64xbf16, #tpu.memory_space<vmem>>, %arg5: memref<1x64xf32, #tpu.memory_space<vmem>>, %arg6: memref<576x64xbf16, #tpu.memory_space<vmem>>, %arg7: memref<1x64xf32, #tpu.memory_space<vmem>>, %arg8: memref<576x512xbf16, #tpu.memory_space<vmem>>, %arg9: memref<1x512xf32, #tpu.memory_space<vmem>>, %arg10: memref<512x128xbf16, #tpu.memory_space<vmem>>, %arg11: memref<1x128xf32, #tpu.memory_space<vmem>>, %arg12: memref<1x1x128xf32, #tpu.memory_space<vmem>>) attributes {dimension_semantics = [#tpu.dimension_semantics<parallel>], iteration_bounds = array<i64: 2>, scalar_prefetch = 0 : i64, scratch_operands = 0 : i64, tpu.core_type = #tpu.core_type<tc>, window_params = [{transform_indices = @transform_0, window_bounds = array<i64: 1, 144, 256>}, {pipeline_mode = #tpu.pipeline_mode<synchronous>, transform_indices = @transform_1, window_bounds = array<i64: 256, 32>}, {pipeline_mode = #tpu.pipeline_mode<synchronous>, transform_indices = @transform_2, window_bounds = array<i64: 1, 32>}, {pipeline_mode = #tpu.pipeline_mode<synchronous>, transform_indices = @transform_3, window_bounds = array<i64: 512, 64>}, {pipeline_mode = #tpu.pipeline_mode<synchronous>, transform_indices = @transform_4, window_bounds = array<i64: 1, 64>}, {pipeline_mode = #tpu.pipeline_mode<synchronous>, transform_indices = @transform_5, window_bounds = array<i64: 576, 64>}, {pipeline_mode = #tpu.pipeline_mode<synchronous>, transform_indices = @transform_6, window_bounds = array<i64: 1, 64>}, {pipeline_mode = #tpu.pipeline_mode<synchronous>, transform_indices = @transform_7, window_bounds = array<i64: 576, 512>}, {pipeline_mode = #tpu.pipeline_mode<synchronous>, transform_indices = @transform_8, window_bounds = array<i64: 1, 512>}, {pipeline_mode = #tpu.pipeline_mode<synchronous>, transform_indices = @transform_9, window_bounds = array<i64: 512, 128>}, {pipeline_mode = #tpu.pipeline_mode<synchronous>, transform_indices = @transform_10, window_bounds = array<i64: 1, 128>}, {transform_indices = @transform_11, window_bounds = array<i64: 1, 1, 128>}]} {
    %c0 = arith.constant 0 : index
    %c0_0 = arith.constant 0 : index
    %c0_1 = arith.constant 0 : index
    %0 = vector.load %arg1[%c0, %c0_0, %c0_1] : memref<1x144x256xbf16, #tpu.memory_space<vmem>>, vector<1x144x256xbf16>
    %1 = vector.shape_cast %0 : vector<1x144x256xbf16> to vector<144x256xbf16>
    %c0_2 = arith.constant 0 : index
    %c0_3 = arith.constant 0 : index
    %2 = vector.load %arg2[%c0_2, %c0_3] : memref<256x32xbf16, #tpu.memory_space<vmem>>, vector<256x32xbf16>
    %cst = arith.constant dense<0.000000e+00> : vector<144x32xf32>
    %3 = tpu.matmul %1, %2, %cst {dimension_numbers = #tpu.dot_dimension_numbers<[1], [0], [0], [1], [0, 0, 1, 1], [], []>} : vector<144x256xbf16>, vector<256x32xbf16>, vector<144x32xf32> -> vector<144x32xf32>
    %c0_4 = arith.constant 0 : index
    %c0_5 = arith.constant 0 : index
    %4 = vector.load %arg3[%c0_4, %c0_5] : memref<1x32xf32, #tpu.memory_space<vmem>>, vector<1x32xf32>
    %5 = vector.broadcast %4 : vector<1x32xf32> to vector<144x32xf32>
    %6 = arith.addf %3, %5 : vector<144x32xf32>
    %cst_6 = arith.constant 0.000000e+00 : f32
    %7 = vector.broadcast %cst_6 : f32 to vector<144x32xf32>
    %8 = arith.maximumf %6, %7 : vector<144x32xf32>
    %9 = arith.truncf %8 : vector<144x32xf32> to vector<144x32xbf16>
    %cst_7 = arith.constant 0.000000e+00 : f32
    %10 = vector.broadcast %cst_7 : f32 to vector<29x64xf32>
    %c0_8 = arith.constant 0 : index
    %c0_9 = arith.constant 0 : index
    %11 = vector.load %arg4[%c0_8, %c0_9] : memref<512x64xbf16, #tpu.memory_space<vmem>>, vector<32x64xbf16>
    %12 = vector.extract_strided_slice %9 {offsets = [0, 0], sizes = [29, 32], strides = [1, 1]} : vector<144x32xbf16> to vector<29x32xbf16>
    %cst_10 = arith.constant dense<0.000000e+00> : vector<29x64xf32>
    %13 = tpu.matmul %12, %11, %cst_10 {dimension_numbers = #tpu.dot_dimension_numbers<[1], [0], [0], [1], [0, 0, 1, 1], [], []>} : vector<29x32xbf16>, vector<32x64xbf16>, vector<29x64xf32> -> vector<29x64xf32>
    %14 = arith.addf %10, %13 : vector<29x64xf32>
    %c64 = arith.constant 64 : index
    %c0_11 = arith.constant 0 : index
    %15 = vector.load %arg4[%c64, %c0_11] : memref<512x64xbf16, #tpu.memory_space<vmem>>, vector<32x64xbf16>
    %16 = vector.extract_strided_slice %9 {offsets = [1, 0], sizes = [29, 32], strides = [1, 1]} : vector<144x32xbf16> to vector<29x32xbf16>
    %cst_12 = arith.constant dense<0.000000e+00> : vector<29x64xf32>
    %17 = tpu.matmul %16, %15, %cst_12 {dimension_numbers = #tpu.dot_dimension_numbers<[1], [0], [0], [1], [0, 0, 1, 1], [], []>} : vector<29x32xbf16>, vector<32x64xbf16>, vector<29x64xf32> -> vector<29x64xf32>
    %18 = arith.addf %14, %17 : vector<29x64xf32>
    %c256 = arith.constant 256 : index
    %c0_13 = arith.constant 0 : index
    %19 = vector.load %arg4[%c256, %c0_13] : memref<512x64xbf16, #tpu.memory_space<vmem>>, vector<32x64xbf16>
    %20 = vector.extract_strided_slice %9 {offsets = [6, 0], sizes = [29, 32], strides = [1, 1]} : vector<144x32xbf16> to vector<29x32xbf16>
    %cst_14 = arith.constant dense<0.000000e+00> : vector<29x64xf32>
    %21 = tpu.matmul %20, %19, %cst_14 {dimension_numbers = #tpu.dot_dimension_numbers<[1], [0], [0], [1], [0, 0, 1, 1], [], []>} : vector<29x32xbf16>, vector<32x64xbf16>, vector<29x64xf32> -> vector<29x64xf32>
    %22 = arith.addf %18, %21 : vector<29x64xf32>
    %c320 = arith.constant 320 : index
    %c0_15 = arith.constant 0 : index
    %23 = vector.load %arg4[%c320, %c0_15] : memref<512x64xbf16, #tpu.memory_space<vmem>>, vector<32x64xbf16>
    %24 = vector.extract_strided_slice %9 {offsets = [7, 0], sizes = [29, 32], strides = [1, 1]} : vector<144x32xbf16> to vector<29x32xbf16>
    %cst_16 = arith.constant dense<0.000000e+00> : vector<29x64xf32>
    %25 = tpu.matmul %24, %23, %cst_16 {dimension_numbers = #tpu.dot_dimension_numbers<[1], [0], [0], [1], [0, 0, 1, 1], [], []>} : vector<29x32xbf16>, vector<32x64xbf16>, vector<29x64xf32> -> vector<29x64xf32>
    %26 = arith.addf %22, %25 : vector<29x64xf32>
    %c32 = arith.constant 32 : index
    %c0_17 = arith.constant 0 : index
    %27 = vector.load %arg4[%c32, %c0_17] : memref<512x64xbf16, #tpu.memory_space<vmem>>, vector<32x64xbf16>
    %28 = vector.extract_strided_slice %9 {offsets = [36, 0], sizes = [29, 32], strides = [1, 1]} : vector<144x32xbf16> to vector<29x32xbf16>
    %cst_18 = arith.constant dense<0.000000e+00> : vector<29x64xf32>
    %29 = tpu.matmul %28, %27, %cst_18 {dimension_numbers = #tpu.dot_dimension_numbers<[1], [0], [0], [1], [0, 0, 1, 1], [], []>} : vector<29x32xbf16>, vector<32x64xbf16>, vector<29x64xf32> -> vector<29x64xf32>
    %30 = arith.addf %26, %29 : vector<29x64xf32>
    %c96 = arith.constant 96 : index
    %c0_19 = arith.constant 0 : index
    %31 = vector.load %arg4[%c96, %c0_19] : memref<512x64xbf16, #tpu.memory_space<vmem>>, vector<32x64xbf16>
    %32 = vector.extract_strided_slice %9 {offsets = [37, 0], sizes = [29, 32], strides = [1, 1]} : vector<144x32xbf16> to vector<29x32xbf16>
    %cst_20 = arith.constant dense<0.000000e+00> : vector<29x64xf32>
    %33 = tpu.matmul %32, %31, %cst_20 {dimension_numbers = #tpu.dot_dimension_numbers<[1], [0], [0], [1], [0, 0, 1, 1], [], []>} : vector<29x32xbf16>, vector<32x64xbf16>, vector<29x64xf32> -> vector<29x64xf32>
    %34 = arith.addf %30, %33 : vector<29x64xf32>
    %c288 = arith.constant 288 : index
    %c0_21 = arith.constant 0 : index
    %35 = vector.load %arg4[%c288, %c0_21] : memref<512x64xbf16, #tpu.memory_space<vmem>>, vector<32x64xbf16>
    %36 = vector.extract_strided_slice %9 {offsets = [42, 0], sizes = [29, 32], strides = [1, 1]} : vector<144x32xbf16> to vector<29x32xbf16>
    %cst_22 = arith.constant dense<0.000000e+00> : vector<29x64xf32>
    %37 = tpu.matmul %36, %35, %cst_22 {dimension_numbers = #tpu.dot_dimension_numbers<[1], [0], [0], [1], [0, 0, 1, 1], [], []>} : vector<29x32xbf16>, vector<32x64xbf16>, vector<29x64xf32> -> vector<29x64xf32>
    %38 = arith.addf %34, %37 : vector<29x64xf32>
    %c352 = arith.constant 352 : index
    %c0_23 = arith.constant 0 : index
    %39 = vector.load %arg4[%c352, %c0_23] : memref<512x64xbf16, #tpu.memory_space<vmem>>, vector<32x64xbf16>
    %40 = vector.extract_strided_slice %9 {offsets = [43, 0], sizes = [29, 32], strides = [1, 1]} : vector<144x32xbf16> to vector<29x32xbf16>
    %cst_24 = arith.constant dense<0.000000e+00> : vector<29x64xf32>
    %41 = tpu.matmul %40, %39, %cst_24 {dimension_numbers = #tpu.dot_dimension_numbers<[1], [0], [0], [1], [0, 0, 1, 1], [], []>} : vector<29x32xbf16>, vector<32x64xbf16>, vector<29x64xf32> -> vector<29x64xf32>
    %42 = arith.addf %38, %41 : vector<29x64xf32>
    %c128 = arith.constant 128 : index
    %c0_25 = arith.constant 0 : index
    %43 = vector.load %arg4[%c128, %c0_25] : memref<512x64xbf16, #tpu.memory_space<vmem>>, vector<32x64xbf16>
    %44 = vector.extract_strided_slice %9 {offsets = [72, 0], sizes = [29, 32], strides = [1, 1]} : vector<144x32xbf16> to vector<29x32xbf16>
    %cst_26 = arith.constant dense<0.000000e+00> : vector<29x64xf32>
    %45 = tpu.matmul %44, %43, %cst_26 {dimension_numbers = #tpu.dot_dimension_numbers<[1], [0], [0], [1], [0, 0, 1, 1], [], []>} : vector<29x32xbf16>, vector<32x64xbf16>, vector<29x64xf32> -> vector<29x64xf32>
    %46 = arith.addf %42, %45 : vector<29x64xf32>
    %c192 = arith.constant 192 : index
    %c0_27 = arith.constant 0 : index
    %47 = vector.load %arg4[%c192, %c0_27] : memref<512x64xbf16, #tpu.memory_space<vmem>>, vector<32x64xbf16>
    %48 = vector.extract_strided_slice %9 {offsets = [73, 0], sizes = [29, 32], strides = [1, 1]} : vector<144x32xbf16> to vector<29x32xbf16>
    %cst_28 = arith.constant dense<0.000000e+00> : vector<29x64xf32>
    %49 = tpu.matmul %48, %47, %cst_28 {dimension_numbers = #tpu.dot_dimension_numbers<[1], [0], [0], [1], [0, 0, 1, 1], [], []>} : vector<29x32xbf16>, vector<32x64xbf16>, vector<29x64xf32> -> vector<29x64xf32>
    %50 = arith.addf %46, %49 : vector<29x64xf32>
    %c384 = arith.constant 384 : index
    %c0_29 = arith.constant 0 : index
    %51 = vector.load %arg4[%c384, %c0_29] : memref<512x64xbf16, #tpu.memory_space<vmem>>, vector<32x64xbf16>
    %52 = vector.extract_strided_slice %9 {offsets = [78, 0], sizes = [29, 32], strides = [1, 1]} : vector<144x32xbf16> to vector<29x32xbf16>
    %cst_30 = arith.constant dense<0.000000e+00> : vector<29x64xf32>
    %53 = tpu.matmul %52, %51, %cst_30 {dimension_numbers = #tpu.dot_dimension_numbers<[1], [0], [0], [1], [0, 0, 1, 1], [], []>} : vector<29x32xbf16>, vector<32x64xbf16>, vector<29x64xf32> -> vector<29x64xf32>
    %54 = arith.addf %50, %53 : vector<29x64xf32>
    %c448 = arith.constant 448 : index
    %c0_31 = arith.constant 0 : index
    %55 = vector.load %arg4[%c448, %c0_31] : memref<512x64xbf16, #tpu.memory_space<vmem>>, vector<32x64xbf16>
    %56 = vector.extract_strided_slice %9 {offsets = [79, 0], sizes = [29, 32], strides = [1, 1]} : vector<144x32xbf16> to vector<29x32xbf16>
    %cst_32 = arith.constant dense<0.000000e+00> : vector<29x64xf32>
    %57 = tpu.matmul %56, %55, %cst_32 {dimension_numbers = #tpu.dot_dimension_numbers<[1], [0], [0], [1], [0, 0, 1, 1], [], []>} : vector<29x32xbf16>, vector<32x64xbf16>, vector<29x64xf32> -> vector<29x64xf32>
    %58 = arith.addf %54, %57 : vector<29x64xf32>
    %c160 = arith.constant 160 : index
    %c0_33 = arith.constant 0 : index
    %59 = vector.load %arg4[%c160, %c0_33] : memref<512x64xbf16, #tpu.memory_space<vmem>>, vector<32x64xbf16>
    %60 = vector.extract_strided_slice %9 {offsets = [108, 0], sizes = [29, 32], strides = [1, 1]} : vector<144x32xbf16> to vector<29x32xbf16>
    %cst_34 = arith.constant dense<0.000000e+00> : vector<29x64xf32>
    %61 = tpu.matmul %60, %59, %cst_34 {dimension_numbers = #tpu.dot_dimension_numbers<[1], [0], [0], [1], [0, 0, 1, 1], [], []>} : vector<29x32xbf16>, vector<32x64xbf16>, vector<29x64xf32> -> vector<29x64xf32>
    %62 = arith.addf %58, %61 : vector<29x64xf32>
    %c224 = arith.constant 224 : index
    %c0_35 = arith.constant 0 : index
    %63 = vector.load %arg4[%c224, %c0_35] : memref<512x64xbf16, #tpu.memory_space<vmem>>, vector<32x64xbf16>
    %64 = vector.extract_strided_slice %9 {offsets = [109, 0], sizes = [29, 32], strides = [1, 1]} : vector<144x32xbf16> to vector<29x32xbf16>
    %cst_36 = arith.constant dense<0.000000e+00> : vector<29x64xf32>
    %65 = tpu.matmul %64, %63, %cst_36 {dimension_numbers = #tpu.dot_dimension_numbers<[1], [0], [0], [1], [0, 0, 1, 1], [], []>} : vector<29x32xbf16>, vector<32x64xbf16>, vector<29x64xf32> -> vector<29x64xf32>
    %66 = arith.addf %62, %65 : vector<29x64xf32>
    %c416 = arith.constant 416 : index
    %c0_37 = arith.constant 0 : index
    %67 = vector.load %arg4[%c416, %c0_37] : memref<512x64xbf16, #tpu.memory_space<vmem>>, vector<32x64xbf16>
    %68 = vector.extract_strided_slice %9 {offsets = [114, 0], sizes = [29, 32], strides = [1, 1]} : vector<144x32xbf16> to vector<29x32xbf16>
    %cst_38 = arith.constant dense<0.000000e+00> : vector<29x64xf32>
    %69 = tpu.matmul %68, %67, %cst_38 {dimension_numbers = #tpu.dot_dimension_numbers<[1], [0], [0], [1], [0, 0, 1, 1], [], []>} : vector<29x32xbf16>, vector<32x64xbf16>, vector<29x64xf32> -> vector<29x64xf32>
    %70 = arith.addf %66, %69 : vector<29x64xf32>
    %c480 = arith.constant 480 : index
    %c0_39 = arith.constant 0 : index
    %71 = vector.load %arg4[%c480, %c0_39] : memref<512x64xbf16, #tpu.memory_space<vmem>>, vector<32x64xbf16>
    %72 = vector.extract_strided_slice %9 {offsets = [115, 0], sizes = [29, 32], strides = [1, 1]} : vector<144x32xbf16> to vector<29x32xbf16>
    %cst_40 = arith.constant dense<0.000000e+00> : vector<29x64xf32>
    %73 = tpu.matmul %72, %71, %cst_40 {dimension_numbers = #tpu.dot_dimension_numbers<[1], [0], [0], [1], [0, 0, 1, 1], [], []>} : vector<29x32xbf16>, vector<32x64xbf16>, vector<29x64xf32> -> vector<29x64xf32>
    %74 = arith.addf %70, %73 : vector<29x64xf32>
    %c0_41 = arith.constant 0 : index
    %c0_42 = arith.constant 0 : index
    %75 = vector.load %arg5[%c0_41, %c0_42] : memref<1x64xf32, #tpu.memory_space<vmem>>, vector<1x64xf32>
    %76 = vector.broadcast %75 : vector<1x64xf32> to vector<29x64xf32>
    %77 = arith.addf %74, %76 : vector<29x64xf32>
    %cst_43 = arith.constant 0.000000e+00 : f32
    %78 = vector.broadcast %cst_43 : f32 to vector<29x64xf32>
    %79 = arith.maximumf %77, %78 : vector<29x64xf32>
    %80 = arith.truncf %79 : vector<29x64xf32> to vector<29x64xbf16>
    %cst_44 = arith.constant 0.000000e+00 : f32
    %81 = vector.broadcast %cst_44 : f32 to vector<15x64xf32>
    %c0_45 = arith.constant 0 : index
    %c0_46 = arith.constant 0 : index
    %82 = vector.load %arg6[%c0_45, %c0_46] : memref<576x64xbf16, #tpu.memory_space<vmem>>, vector<64x64xbf16>
    %83 = vector.extract_strided_slice %80 {offsets = [0, 0], sizes = [15, 64], strides = [1, 1]} : vector<29x64xbf16> to vector<15x64xbf16>
    %cst_47 = arith.constant dense<0.000000e+00> : vector<15x64xf32>
    %84 = tpu.matmul %83, %82, %cst_47 {dimension_numbers = #tpu.dot_dimension_numbers<[1], [0], [0], [1], [0, 0, 1, 1], [], []>} : vector<15x64xbf16>, vector<64x64xbf16>, vector<15x64xf32> -> vector<15x64xf32>
    %85 = arith.addf %81, %84 : vector<15x64xf32>
    %c64_48 = arith.constant 64 : index
    %c0_49 = arith.constant 0 : index
    %86 = vector.load %arg6[%c64_48, %c0_49] : memref<576x64xbf16, #tpu.memory_space<vmem>>, vector<64x64xbf16>
    %87 = vector.extract_strided_slice %80 {offsets = [1, 0], sizes = [15, 64], strides = [1, 1]} : vector<29x64xbf16> to vector<15x64xbf16>
    %cst_50 = arith.constant dense<0.000000e+00> : vector<15x64xf32>
    %88 = tpu.matmul %87, %86, %cst_50 {dimension_numbers = #tpu.dot_dimension_numbers<[1], [0], [0], [1], [0, 0, 1, 1], [], []>} : vector<15x64xbf16>, vector<64x64xbf16>, vector<15x64xf32> -> vector<15x64xf32>
    %89 = arith.addf %85, %88 : vector<15x64xf32>
    %c128_51 = arith.constant 128 : index
    %c0_52 = arith.constant 0 : index
    %90 = vector.load %arg6[%c128_51, %c0_52] : memref<576x64xbf16, #tpu.memory_space<vmem>>, vector<64x64xbf16>
    %91 = vector.extract_strided_slice %80 {offsets = [2, 0], sizes = [15, 64], strides = [1, 1]} : vector<29x64xbf16> to vector<15x64xbf16>
    %cst_53 = arith.constant dense<0.000000e+00> : vector<15x64xf32>
    %92 = tpu.matmul %91, %90, %cst_53 {dimension_numbers = #tpu.dot_dimension_numbers<[1], [0], [0], [1], [0, 0, 1, 1], [], []>} : vector<15x64xbf16>, vector<64x64xbf16>, vector<15x64xf32> -> vector<15x64xf32>
    %93 = arith.addf %89, %92 : vector<15x64xf32>
    %c192_54 = arith.constant 192 : index
    %c0_55 = arith.constant 0 : index
    %94 = vector.load %arg6[%c192_54, %c0_55] : memref<576x64xbf16, #tpu.memory_space<vmem>>, vector<64x64xbf16>
    %95 = vector.extract_strided_slice %80 {offsets = [6, 0], sizes = [15, 64], strides = [1, 1]} : vector<29x64xbf16> to vector<15x64xbf16>
    %cst_56 = arith.constant dense<0.000000e+00> : vector<15x64xf32>
    %96 = tpu.matmul %95, %94, %cst_56 {dimension_numbers = #tpu.dot_dimension_numbers<[1], [0], [0], [1], [0, 0, 1, 1], [], []>} : vector<15x64xbf16>, vector<64x64xbf16>, vector<15x64xf32> -> vector<15x64xf32>
    %97 = arith.addf %93, %96 : vector<15x64xf32>
    %c256_57 = arith.constant 256 : index
    %c0_58 = arith.constant 0 : index
    %98 = vector.load %arg6[%c256_57, %c0_58] : memref<576x64xbf16, #tpu.memory_space<vmem>>, vector<64x64xbf16>
    %99 = vector.extract_strided_slice %80 {offsets = [7, 0], sizes = [15, 64], strides = [1, 1]} : vector<29x64xbf16> to vector<15x64xbf16>
    %cst_59 = arith.constant dense<0.000000e+00> : vector<15x64xf32>
    %100 = tpu.matmul %99, %98, %cst_59 {dimension_numbers = #tpu.dot_dimension_numbers<[1], [0], [0], [1], [0, 0, 1, 1], [], []>} : vector<15x64xbf16>, vector<64x64xbf16>, vector<15x64xf32> -> vector<15x64xf32>
    %101 = arith.addf %97, %100 : vector<15x64xf32>
    %c320_60 = arith.constant 320 : index
    %c0_61 = arith.constant 0 : index
    %102 = vector.load %arg6[%c320_60, %c0_61] : memref<576x64xbf16, #tpu.memory_space<vmem>>, vector<64x64xbf16>
    %103 = vector.extract_strided_slice %80 {offsets = [8, 0], sizes = [15, 64], strides = [1, 1]} : vector<29x64xbf16> to vector<15x64xbf16>
    %cst_62 = arith.constant dense<0.000000e+00> : vector<15x64xf32>
    %104 = tpu.matmul %103, %102, %cst_62 {dimension_numbers = #tpu.dot_dimension_numbers<[1], [0], [0], [1], [0, 0, 1, 1], [], []>} : vector<15x64xbf16>, vector<64x64xbf16>, vector<15x64xf32> -> vector<15x64xf32>
    %105 = arith.addf %101, %104 : vector<15x64xf32>
    %c384_63 = arith.constant 384 : index
    %c0_64 = arith.constant 0 : index
    %106 = vector.load %arg6[%c384_63, %c0_64] : memref<576x64xbf16, #tpu.memory_space<vmem>>, vector<64x64xbf16>
    %107 = vector.extract_strided_slice %80 {offsets = [12, 0], sizes = [15, 64], strides = [1, 1]} : vector<29x64xbf16> to vector<15x64xbf16>
    %cst_65 = arith.constant dense<0.000000e+00> : vector<15x64xf32>
    %108 = tpu.matmul %107, %106, %cst_65 {dimension_numbers = #tpu.dot_dimension_numbers<[1], [0], [0], [1], [0, 0, 1, 1], [], []>} : vector<15x64xbf16>, vector<64x64xbf16>, vector<15x64xf32> -> vector<15x64xf32>
    %109 = arith.addf %105, %108 : vector<15x64xf32>
    %c448_66 = arith.constant 448 : index
    %c0_67 = arith.constant 0 : index
    %110 = vector.load %arg6[%c448_66, %c0_67] : memref<576x64xbf16, #tpu.memory_space<vmem>>, vector<64x64xbf16>
    %111 = vector.extract_strided_slice %80 {offsets = [13, 0], sizes = [15, 64], strides = [1, 1]} : vector<29x64xbf16> to vector<15x64xbf16>
    %cst_68 = arith.constant dense<0.000000e+00> : vector<15x64xf32>
    %112 = tpu.matmul %111, %110, %cst_68 {dimension_numbers = #tpu.dot_dimension_numbers<[1], [0], [0], [1], [0, 0, 1, 1], [], []>} : vector<15x64xbf16>, vector<64x64xbf16>, vector<15x64xf32> -> vector<15x64xf32>
    %113 = arith.addf %109, %112 : vector<15x64xf32>
    %c512 = arith.constant 512 : index
    %c0_69 = arith.constant 0 : index
    %114 = vector.load %arg6[%c512, %c0_69] : memref<576x64xbf16, #tpu.memory_space<vmem>>, vector<64x64xbf16>
    %115 = vector.extract_strided_slice %80 {offsets = [14, 0], sizes = [15, 64], strides = [1, 1]} : vector<29x64xbf16> to vector<15x64xbf16>
    %cst_70 = arith.constant dense<0.000000e+00> : vector<15x64xf32>
    %116 = tpu.matmul %115, %114, %cst_70 {dimension_numbers = #tpu.dot_dimension_numbers<[1], [0], [0], [1], [0, 0, 1, 1], [], []>} : vector<15x64xbf16>, vector<64x64xbf16>, vector<15x64xf32> -> vector<15x64xf32>
    %117 = arith.addf %113, %116 : vector<15x64xf32>
    %c0_71 = arith.constant 0 : index
    %c0_72 = arith.constant 0 : index
    %118 = vector.load %arg7[%c0_71, %c0_72] : memref<1x64xf32, #tpu.memory_space<vmem>>, vector<1x64xf32>
    %119 = vector.broadcast %118 : vector<1x64xf32> to vector<15x64xf32>
    %120 = arith.addf %117, %119 : vector<15x64xf32>
    %cst_73 = arith.constant 0.000000e+00 : f32
    %121 = vector.broadcast %cst_73 : f32 to vector<15x64xf32>
    %122 = arith.maximumf %120, %121 : vector<15x64xf32>
    %123 = arith.truncf %122 : vector<15x64xf32> to vector<15x64xbf16>
    %cst_74 = arith.constant 0.000000e+00 : f32
    %124 = vector.broadcast %cst_74 : f32 to vector<1x512xf32>
    %c0_75 = arith.constant 0 : index
    %c0_76 = arith.constant 0 : index
    %125 = vector.load %arg8[%c0_75, %c0_76] : memref<576x512xbf16, #tpu.memory_space<vmem>>, vector<64x512xbf16>
    %126 = vector.extract_strided_slice %123 {offsets = [0, 0], sizes = [1, 64], strides = [1, 1]} : vector<15x64xbf16> to vector<1x64xbf16>
    %cst_77 = arith.constant dense<0.000000e+00> : vector<1x512xf32>
    %127 = tpu.matmul %126, %125, %cst_77 {dimension_numbers = #tpu.dot_dimension_numbers<[1], [0], [0], [1], [0, 0, 1, 1], [], []>} : vector<1x64xbf16>, vector<64x512xbf16>, vector<1x512xf32> -> vector<1x512xf32>
    %128 = arith.addf %124, %127 : vector<1x512xf32>
    %c64_78 = arith.constant 64 : index
    %c0_79 = arith.constant 0 : index
    %129 = vector.load %arg8[%c64_78, %c0_79] : memref<576x512xbf16, #tpu.memory_space<vmem>>, vector<64x512xbf16>
    %130 = vector.extract_strided_slice %123 {offsets = [1, 0], sizes = [1, 64], strides = [1, 1]} : vector<15x64xbf16> to vector<1x64xbf16>
    %cst_80 = arith.constant dense<0.000000e+00> : vector<1x512xf32>
    %131 = tpu.matmul %130, %129, %cst_80 {dimension_numbers = #tpu.dot_dimension_numbers<[1], [0], [0], [1], [0, 0, 1, 1], [], []>} : vector<1x64xbf16>, vector<64x512xbf16>, vector<1x512xf32> -> vector<1x512xf32>
    %132 = arith.addf %128, %131 : vector<1x512xf32>
    %c128_81 = arith.constant 128 : index
    %c0_82 = arith.constant 0 : index
    %133 = vector.load %arg8[%c128_81, %c0_82] : memref<576x512xbf16, #tpu.memory_space<vmem>>, vector<64x512xbf16>
    %134 = vector.extract_strided_slice %123 {offsets = [2, 0], sizes = [1, 64], strides = [1, 1]} : vector<15x64xbf16> to vector<1x64xbf16>
    %cst_83 = arith.constant dense<0.000000e+00> : vector<1x512xf32>
    %135 = tpu.matmul %134, %133, %cst_83 {dimension_numbers = #tpu.dot_dimension_numbers<[1], [0], [0], [1], [0, 0, 1, 1], [], []>} : vector<1x64xbf16>, vector<64x512xbf16>, vector<1x512xf32> -> vector<1x512xf32>
    %136 = arith.addf %132, %135 : vector<1x512xf32>
    %c192_84 = arith.constant 192 : index
    %c0_85 = arith.constant 0 : index
    %137 = vector.load %arg8[%c192_84, %c0_85] : memref<576x512xbf16, #tpu.memory_space<vmem>>, vector<64x512xbf16>
    %138 = vector.extract_strided_slice %123 {offsets = [6, 0], sizes = [1, 64], strides = [1, 1]} : vector<15x64xbf16> to vector<1x64xbf16>
    %cst_86 = arith.constant dense<0.000000e+00> : vector<1x512xf32>
    %139 = tpu.matmul %138, %137, %cst_86 {dimension_numbers = #tpu.dot_dimension_numbers<[1], [0], [0], [1], [0, 0, 1, 1], [], []>} : vector<1x64xbf16>, vector<64x512xbf16>, vector<1x512xf32> -> vector<1x512xf32>
    %140 = arith.addf %136, %139 : vector<1x512xf32>
    %c256_87 = arith.constant 256 : index
    %c0_88 = arith.constant 0 : index
    %141 = vector.load %arg8[%c256_87, %c0_88] : memref<576x512xbf16, #tpu.memory_space<vmem>>, vector<64x512xbf16>
    %142 = vector.extract_strided_slice %123 {offsets = [7, 0], sizes = [1, 64], strides = [1, 1]} : vector<15x64xbf16> to vector<1x64xbf16>
    %cst_89 = arith.constant dense<0.000000e+00> : vector<1x512xf32>
    %143 = tpu.matmul %142, %141, %cst_89 {dimension_numbers = #tpu.dot_dimension_numbers<[1], [0], [0], [1], [0, 0, 1, 1], [], []>} : vector<1x64xbf16>, vector<64x512xbf16>, vector<1x512xf32> -> vector<1x512xf32>
    %144 = arith.addf %140, %143 : vector<1x512xf32>
    %c320_90 = arith.constant 320 : index
    %c0_91 = arith.constant 0 : index
    %145 = vector.load %arg8[%c320_90, %c0_91] : memref<576x512xbf16, #tpu.memory_space<vmem>>, vector<64x512xbf16>
    %146 = vector.extract_strided_slice %123 {offsets = [8, 0], sizes = [1, 64], strides = [1, 1]} : vector<15x64xbf16> to vector<1x64xbf16>
    %cst_92 = arith.constant dense<0.000000e+00> : vector<1x512xf32>
    %147 = tpu.matmul %146, %145, %cst_92 {dimension_numbers = #tpu.dot_dimension_numbers<[1], [0], [0], [1], [0, 0, 1, 1], [], []>} : vector<1x64xbf16>, vector<64x512xbf16>, vector<1x512xf32> -> vector<1x512xf32>
    %148 = arith.addf %144, %147 : vector<1x512xf32>
    %c384_93 = arith.constant 384 : index
    %c0_94 = arith.constant 0 : index
    %149 = vector.load %arg8[%c384_93, %c0_94] : memref<576x512xbf16, #tpu.memory_space<vmem>>, vector<64x512xbf16>
    %150 = vector.extract_strided_slice %123 {offsets = [12, 0], sizes = [1, 64], strides = [1, 1]} : vector<15x64xbf16> to vector<1x64xbf16>
    %cst_95 = arith.constant dense<0.000000e+00> : vector<1x512xf32>
    %151 = tpu.matmul %150, %149, %cst_95 {dimension_numbers = #tpu.dot_dimension_numbers<[1], [0], [0], [1], [0, 0, 1, 1], [], []>} : vector<1x64xbf16>, vector<64x512xbf16>, vector<1x512xf32> -> vector<1x512xf32>
    %152 = arith.addf %148, %151 : vector<1x512xf32>
    %c448_96 = arith.constant 448 : index
    %c0_97 = arith.constant 0 : index
    %153 = vector.load %arg8[%c448_96, %c0_97] : memref<576x512xbf16, #tpu.memory_space<vmem>>, vector<64x512xbf16>
    %154 = vector.extract_strided_slice %123 {offsets = [13, 0], sizes = [1, 64], strides = [1, 1]} : vector<15x64xbf16> to vector<1x64xbf16>
    %cst_98 = arith.constant dense<0.000000e+00> : vector<1x512xf32>
    %155 = tpu.matmul %154, %153, %cst_98 {dimension_numbers = #tpu.dot_dimension_numbers<[1], [0], [0], [1], [0, 0, 1, 1], [], []>} : vector<1x64xbf16>, vector<64x512xbf16>, vector<1x512xf32> -> vector<1x512xf32>
    %156 = arith.addf %152, %155 : vector<1x512xf32>
    %c512_99 = arith.constant 512 : index
    %c0_100 = arith.constant 0 : index
    %157 = vector.load %arg8[%c512_99, %c0_100] : memref<576x512xbf16, #tpu.memory_space<vmem>>, vector<64x512xbf16>
    %158 = vector.extract_strided_slice %123 {offsets = [14, 0], sizes = [1, 64], strides = [1, 1]} : vector<15x64xbf16> to vector<1x64xbf16>
    %cst_101 = arith.constant dense<0.000000e+00> : vector<1x512xf32>
    %159 = tpu.matmul %158, %157, %cst_101 {dimension_numbers = #tpu.dot_dimension_numbers<[1], [0], [0], [1], [0, 0, 1, 1], [], []>} : vector<1x64xbf16>, vector<64x512xbf16>, vector<1x512xf32> -> vector<1x512xf32>
    %160 = arith.addf %156, %159 : vector<1x512xf32>
    %c0_102 = arith.constant 0 : index
    %c0_103 = arith.constant 0 : index
    %161 = vector.load %arg9[%c0_102, %c0_103] : memref<1x512xf32, #tpu.memory_space<vmem>>, vector<1x512xf32>
    %162 = arith.addf %160, %161 : vector<1x512xf32>
    %cst_104 = arith.constant 0.000000e+00 : f32
    %163 = vector.broadcast %cst_104 : f32 to vector<1x512xf32>
    %164 = arith.maximumf %162, %163 : vector<1x512xf32>
    %165 = arith.truncf %164 : vector<1x512xf32> to vector<1x512xbf16>
    %c0_105 = arith.constant 0 : index
    %c0_106 = arith.constant 0 : index
    %166 = vector.load %arg10[%c0_105, %c0_106] : memref<512x128xbf16, #tpu.memory_space<vmem>>, vector<512x128xbf16>
    %cst_107 = arith.constant dense<0.000000e+00> : vector<1x128xf32>
    %167 = tpu.matmul %165, %166, %cst_107 {dimension_numbers = #tpu.dot_dimension_numbers<[1], [0], [0], [1], [0, 0, 1, 1], [], []>} : vector<1x512xbf16>, vector<512x128xbf16>, vector<1x128xf32> -> vector<1x128xf32>
    %c0_108 = arith.constant 0 : index
    %c0_109 = arith.constant 0 : index
    %168 = vector.load %arg11[%c0_108, %c0_109] : memref<1x128xf32, #tpu.memory_space<vmem>>, vector<1x128xf32>
    %169 = arith.addf %167, %168 : vector<1x128xf32>
    %c0_110 = arith.constant 0 : index
    %c0_111 = arith.constant 0 : index
    %c0_112 = arith.constant 0 : index
    %170 = vector.load %arg12[%c0_110, %c0_111, %c0_112] : memref<1x1x128xf32, #tpu.memory_space<vmem>>, vector<1x1x128xf32>
    %171 = vector.shape_cast %170 : vector<1x1x128xf32> to vector<1x128xf32>
    %172 = vector.shape_cast %169 : vector<1x128xf32> to vector<1x1x128xf32>
    tpu.vector_store %arg12[%c0_110, %c0_111, %c0_112], %172 {strides = array<i32>} : memref<1x1x128xf32, #tpu.memory_space<vmem>>, vector<1x1x128xf32>,
    return
  }
  func.func @transform_0(%arg0: i32) -> (i32, i32, i32) {
    %c0_i32 = arith.constant 0 : i32
    %c0_i32_0 = arith.constant 0 : i32
    %c0_i32_1 = arith.constant 0 : i32
    return %arg0, %c0_i32, %c0_i32_0 : i32, i32, i32
  }
  func.func @transform_1(%arg0: i32) -> (i32, i32) {
    %c0_i32 = arith.constant 0 : i32
    %c0_i32_0 = arith.constant 0 : i32
    %c0_i32_1 = arith.constant 0 : i32
    return %c0_i32, %c0_i32_0 : i32, i32
  }
  func.func @transform_2(%arg0: i32) -> (i32, i32) {
    %c0_i32 = arith.constant 0 : i32
    %c0_i32_0 = arith.constant 0 : i32
    %c0_i32_1 = arith.constant 0 : i32
    return %c0_i32, %c0_i32_0 : i32, i32
  }
  func.func @transform_3(%arg0: i32) -> (i32, i32) {
    %c0_i32 = arith.constant 0 : i32
    %c0_i32_0 = arith.constant 0 : i32
    %c0_i32_1 = arith.constant 0 : i32
    return %c0_i32, %c0_i32_0 : i32, i32
  }
  func.func @transform_4(%arg0: i32) -> (i32, i32) {
    %c0_i32 = arith.constant 0 : i32
    %c0_i32_0 = arith.constant 0 : i32
    %c0_i32_1 = arith.constant 0 : i32
    return %c0_i32, %c0_i32_0 : i32, i32
  }
  func.func @transform_5(%arg0: i32) -> (i32, i32) {
    %c0_i32 = arith.constant 0 : i32
    %c0_i32_0 = arith.constant 0 : i32
    %c0_i32_1 = arith.constant 0 : i32
    return %c0_i32, %c0_i32_0 : i32, i32
  }
  func.func @transform_6(%arg0: i32) -> (i32, i32) {
    %c0_i32 = arith.constant 0 : i32
    %c0_i32_0 = arith.constant 0 : i32
    %c0_i32_1 = arith.constant 0 : i32
    return %c0_i32, %c0_i32_0 : i32, i32
  }
  func.func @transform_7(%arg0: i32) -> (i32, i32) {
    %c0_i32 = arith.constant 0 : i32
    %c0_i32_0 = arith.constant 0 : i32
    %c0_i32_1 = arith.constant 0 : i32
    return %c0_i32, %c0_i32_0 : i32, i32
  }
  func.func @transform_8(%arg0: i32) -> (i32, i32) {
    %c0_i32 = arith.constant 0 : i32
    %c0_i32_0 = arith.constant 0 : i32
    %c0_i32_1 = arith.constant 0 : i32
    return %c0_i32, %c0_i32_0 : i32, i32
  }
  func.func @transform_9(%arg0: i32) -> (i32, i32) {
    %c0_i32 = arith.constant 0 : i32
    %c0_i32_0 = arith.constant 0 : i32
    %c0_i32_1 = arith.constant 0 : i32
    return %c0_i32, %c0_i32_0 : i32, i32
  }
  func.func @transform_10(%arg0: i32) -> (i32, i32) {
    %c0_i32 = arith.constant 0 : i32
    %c0_i32_0 = arith.constant 0 : i32
    %c0_i32_1 = arith.constant 0 : i32
    return %c0_i32, %c0_i32_0 : i32, i32
  }
  func.func @transform_11(%arg0: i32) -> (i32, i32, i32) {
    %c0_i32 = arith.constant 0 : i32
    %c0_i32_0 = arith.constant 0 : i32
    %c0_i32_1 = arith.constant 0 : i32
    return %arg0, %c0_i32, %c0_i32_0 : i32, i32, i32
  }
}

</mosaic_0001>

<bundles_post_ra>
// kernel: double_dqn_forward.1
= control target key start
LH: loop header
LB: loop body
LE: loop exit
PB: predicated region body
PF: predicated region fallthrough
CT: control target
= control target key end

     0   :  { %16 = vsyncpa [#allocation3], 0  ;;  %s7562_s0 = inlined_call_operand.vmem [shape: bf16[2,144,256], index: 0, kind: input, shape index: {}]   ;;  %s7563_s1 = inlined_call_operand.vmem [shape: bf16[256,32], index: 1, kind: input, shape index: {}]   ;;  %s7564_s2 = inlined_call_operand.vmem [shape: f32[1,32], index: 2, kind: input, shape index: {}]   ;;  %s7565_s3 = inlined_call_operand.vmem [shape: bf16[512,64], index: 3, kind: input, shape index: {}]   ;;  %s7566_s4 = inlined_call_operand.vmem [shape: f32[1,64], index: 4, kind: input, shape index: {}]   ;;  %s7567_s5 = inlined_call_operand.vmem [shape: bf16[576,64], index: 5, kind: input, shape index: {}]   ;;  %s7568_s6 = inlined_call_operand.vmem [shape: f32[1,64], index: 6, kind: input, shape index: {}]   ;;  %s7569_s7 = inlined_call_operand.vmem [shape: bf16[576,512], index: 7, kind: input, shape index: {}]   ;;  %s7570_s8 = inlined_call_operand.vmem [shape: f32[1,512], index: 8, kind: input, shape index: {}]   ;;  %s7571_s9 = inlined_call_operand.vmem [shape: bf16[512,128], index: 9, kind: input, shape index: {}]   ;;  %s7572_s10 = inlined_call_operand.vmem [shape: f32[1,128], index: 10, kind: input, shape index: {}]   ;;  %s7573_s11 = inlined_call_operand.hbm [shape: f32[2,1,128], index: 11, kind: output, shape index: {}]  }
   0x1   :  { %18 = vsyncpa [#allocation3 + $0x1], 0  ;;  %s6339_s17 = smov 0   ;;  %s6341_s18 = smov 0  }
   0x2   :  { %s6343_s19 = smov 0   ;;  %s6345_s20 = smov 0  }
   0x3 LB: > { %7575 = sst [smem:[#allocation5_spill]] %s6269_s19  ;;  %s6360_s21 = sadd.s32 4294967295, %s6273_s20   ;;  %s6273_s20 = sphi %s6345_s20, %s7584_s20   ;;  %s6269_s19 = sphi %s6343_s19, %s7583_s19   ;;  %s6265_s18 = sphi %s6341_s18, %s7582_s18   ;;  %s6261_s17 = sphi %s6339_s17, %s7581_s17  }
   0x4   : > { %s5004_s22 = sadd.s32 4294967294, %s6273_s20   ;;  %s6364_s23 = sadd.s32 1, %s6273_s20  }
   0x5   : > { %s267_s24 = sadd.s32 1, %s6269_s19  ;;  %s264_s25 = ssub.s32 %s6273_s20, %s6364_s23 }
   0x6   : > { %p277_p0 = scmp.ne.s32.totalorder %s6269_s19, %s6265_s18  ;;  %p265_p1 = scmp.eq.s32.totalorder %s264_s25, 0 }
   0x7   : > { %p278_p2 = scmp.eq.s32.totalorder %s6360_s21, 1  ;;  %p283_p3 = scmp.ne.s32.totalorder %s6265_s18, %s6261_s17 }
   0x8   : > { %p284_p4 = scmp.eq.s32.totalorder %s5004_s22, 1  ;;  %p5007_p7 = scmp.ge.s32.totalorder %s6273_s20, 1 }
   0x9   : > { %s6375_s26 = scalar_select %p265_p1, %s6269_s19, %s267_s24  }
   0xa   : > { %p6377_p5 = por %p278_p2, %p277_p0  ;;  %p6381_p6 = por %p284_p4, %p283_p3 }
   0xb   : > { %7576 = sst [smem:[#allocation6_spill]] %s6375_s26  ;;  %p340_p8 = scmp.lt.s32.totalorder %s6273_s20, 3 }
   0xd   : > { %p341_p9 = pnand %p5007_p7, %p340_p8 }
   0xe   : > { %p379_p10 = scmp.lt.s32.totalorder (!%p341_p9), %s6360_s21, 1  ;;  %s377_s26 = sand.u32 (!%p341_p9), 1, %s6265_s18  }
   0xf   : > { %344 = sbr.rel (%p341_p9) target bundleno = 1416 (0x588), region = 64  ;;  %s378_s25 = scalar_lea.vmem (!%p341_p9), [#allocation2], %s377_s26 }
  0x10   : > { %s4949_s12 = sshll.u32 (!%p341_p9), %s378_s25, 4  ;;  %s4937_s16 = scalar_lea.sflag (!%p341_p9), [#allocation3], %s377_s26  ;;  %s4950_s12 = int_to_ptr.vmem [resolvable:$true] %s4949_s12 }
  0x11   : > { %s6213_s22 = scalar_lea.vmem (!%p341_p9), %s4950_s12, 16 }
  0x12   : > { %p6214_p11 = scmp.ne.s32.totalorder (!%p341_p9), %s4950_s12, %s6213_s22 }
  0x14   : > { %v5854_v0 = vld [vmem:[%s7563_s1 + $0x78] sm:$0xff]   ;;  %v5856_v2 = vld [vmem:[%s7563_s1 + $0x70] sm:$0xff]   ;;  %v5858_v4 = vld [vmem:[%s7563_s1 + $0x68] sm:$0xff]   ;;  %s380_s29 = scalar_select %p379_p10, %s6360_s21, 1  ;;  %vm768_vm0 = vsmask.f32 7424 }
  0x15   : > { %v5855_v1 = vld [vmem:[%s7563_s1 + $0x38] sm:$0xff]   ;;  %5352 = vmatprep.subr.bf16.mxu0 %v5854_v0  ;;  %v5857_v3 = vld [vmem:[%s7563_s1 + $0x30] sm:$0xff]   ;;  %v5859_v5 = vld [vmem:[%s7563_s1 + $0x28] sm:$0xff]   ;;  %vm796_vm1 = vcmask 261120   ;;  %vm924_vm2 = vcmask 1044480   ;;  %vm1099_vm4 = vcmask 1045504   ;;  %p6215_p12 = pnand %p6214_p11, %p6377_p5 }
  0x16   : > { %5353 = vmatpush3.bf16.msra.mxu0 %v5855_v1  ;;  %v5860_v6 = vld [vmem:[%s7563_s1 + $0x60] sm:$0xff]   ;;  %s5811_s15 = smul.u32 144, %s380_s29  ;;  %v5862_v8 = vld [vmem:[%s7563_s1 + $0x58] sm:$0xff]   ;;  %v5864_v10 = vld [vmem:[%s7563_s1 + $0x50] sm:$0xff]   ;;  %vm1005_vm3 = vsmask.f32 4352 }
  0x17   : > { %5354 = vmatprep.subr.bf16.mxu0 %v5856_v2  ;;  %v5861_v7 = vld [vmem:[%s7563_s1 + $0x20] sm:$0xff]   ;;  %v5863_v9 = vld [vmem:[%s7563_s1 + $0x18] sm:$0xff]   ;;  %v5865_v12 = vld [vmem:[%s7563_s1 + $0x10] sm:$0xff]   ;;  %vm1180_vm5 = vsmask.f32 5376  ;;  %vm1277_vm6 = vcmask 1042432   ;;  %p6216_p13 = pneg %p6215_p12 }
  0x18   : > { %s6419_s30 = scalar_lea.vmem %s7562_s0, %s5811_s15  ;;  %v5866_v13 = vld [vmem:[%s7563_s1 + $0x48] sm:$0xff]   ;;  %v5868_v15 = vld [vmem:[%s7563_s1 + $0x40] sm:$0xff]   ;;  %v5909_v37 = vld [vmem:[%s7565_s3 + $0xd8] sm:$0xff]   ;;  %vm1358_vm7 = vsmask.f32 2304  ;;  %vm1969_vm8 = vcmask 1046528  }
  0x19   : > { %v5872_v11 = vld [vmem:[%s6419_s30 + $0x4] ss:$8 sps:$4 sm:$0xff]   ;;  %v5870_v17 = vld [vmem:[%s6419_s30] ss:$8 sps:$4 sm:$0xff]   ;;  %v5873_v18 = vld [vmem:[%s6419_s30 + $0x14] ss:$8 sps:$4 sm:$0xff]  }
  0x1a   : > { %5355 = vmatpush3.bf16.msra.mxu0 %v5857_v3  ;;  %660 = vmatprep.mubr.bf16.mxu0 %v5872_v11  ;;  %v5867_v14 = vld [vmem:[%s7563_s1 + $0x8] sm:$0xff]   ;;  %v5869_v16 = vld [vmem:[%s7563_s1] sm:$0xff]   ;;  %v5875_v19 = vld [vmem:[%s6419_s30 + $0x10] ss:$8 sps:$4 sm:$0xff]   ;;  %vm1447_vm9 = vcmask 1043456   ;;  %vm1625_vm11 = vcmask 1040384  }
  0x1b   : > { %5356 = vmatprep.subr.bf16.mxu0 %v5858_v4  ;;  %v5876_v20 = vld [vmem:[%s6419_s30 + $0x24] ss:$8 sps:$4 sm:$0xff]   ;;  %v5878_v21 = vld [vmem:[%s6419_s30 + $0x20] ss:$8 sps:$4 sm:$0xff]   ;;  %v5879_v22 = vld [vmem:[%s6419_s30 + $0x34] ss:$8 sps:$4 sm:$0xff]  }
  0x1c   : > { %v5881_v23 = vld [vmem:[%s6419_s30 + $0x30] ss:$8 sps:$4 sm:$0xff]   ;;  %v5882_v24 = vld [vmem:[%s6419_s30 + $0x44] ss:$8 sps:$4 sm:$0xff]   ;;  %v5884_v25 = vld [vmem:[%s6419_s30 + $0x40] ss:$8 sps:$4 sm:$0xff]  }
  0x1d   : > { %v5885_v26 = vld [vmem:[%s6419_s30 + $0x54] ss:$8 sps:$4 sm:$0xff]   ;;  %v5887_v27 = vld [vmem:[%s6419_s30 + $0x50] ss:$8 sps:$4 sm:$0xff]   ;;  %v5888_v28 = vld [vmem:[%s6419_s30 + $0x64] ss:$8 sps:$4 sm:$0xff]  }
  0x1e   : > { %5357 = vmatpush3.bf16.msra.mxu0 %v5859_v5  ;;  %v5890_v29 = vld [vmem:[%s6419_s30 + $0x60] ss:$8 sps:$4 sm:$0xff]   ;;  %v5891_v30 = vld [vmem:[%s6419_s30 + $0x74] ss:$8 sps:$4 sm:$0xff]   ;;  %v5893_v31 = vld [vmem:[%s6419_s30 + $0x70] ss:$8 sps:$4 sm:$0xff]  }
  0x1f   : > { %5358 = vmatprep.subr.bf16.mxu0 %v5860_v6  ;;  %v5894_v32 = vld [vmem:[%s6419_s30 + $0x84] ss:$8 sps:$4 sm:$0xff]   ;;  %v5896_v33 = vld [vmem:[%s6419_s30 + $0x80] ss:$8 sps:$4 sm:$0xff]   ;;  %v5919_v38 = vld [vmem:[%s7565_s3 + $0xd0] sm:$0xff]   ;;  %vm1791_vm13 = vcmask 1041408  }
  0x20   : > { %v5897_v34 = vld [vmem:[%s7565_s3 + $0x28] sm:$0xff]   ;;  %v5898_v35 = vld [vmem:[%s7565_s3 + $0x20] sm:$0xff]   ;;  %vm1528_vm10 = vsmask.f32 3328  ;;  %vm1706_vm12 = vsmask.f32 256 }
  0x21   : > { %5575 = vmatprep.subr.bf16.mxu1 %v5897_v34  ;;  %v5899_v36 = vld [vmem:[%s7565_s3 + $0x8] sm:$0xff]   ;;  %v6478_v42 = vld [vmem:[%s7564_s2] ss:$0 sm:$0xff]  ;;  %vm1872_vm14 = vsmask.f32 1280  ;;  %s5349_s30 = sshll.u32 %s6360_s21, 4 }
  0x22   : > { %5359 = vmatpush3.bf16.msra.mxu0 %v5861_v7  ;;  %5576 = vmatpush3.bf16.msra.mxu1 %v5897_v34  ;;  %vm2048_vm15 = vsmask.f32 6400  ;;  %s4947_s14 = scalar_lea.hbm %s7573_s11, %s5349_s30  ;;  %s6278_s21 = smov [#allocation2]  }
  0x23   : > { %5360 = vmatprep.subr.bf16.mxu0 %v5862_v8  ;;  %5577 = vmatprep.subr.bf16.mxu1 %v5898_v35  ;;  %s6217_s19 = sshll.u32 %s6278_s21, 4  ;;  %s6218_s19 = int_to_ptr.vmem [resolvable:$false] %s6217_s19 }
  0x24   : > { %s6219_s15 = scalar_lea.vmem %s6218_s19, 32  ;;  %p6220_p0 = scmp.lt.s32.totalorder %s4950_s12, %s6218_s19 }
  0x25   : > { %p6221_p1 = scmp.lt.s32.totalorder %s6219_s15, %s6213_s22 }
  0x26   : > { %5361 = vmatpush3.bf16.msra.mxu0 %v5863_v9  ;;  %5578 = vmatpush3.bf16.msra.mxu1 %v5898_v35 }
  0x27   : > { %5362 = vmatprep.subr.bf16.mxu0 %v5864_v10  ;;  %5583 = vmatprep.subr.bf16.mxu1 %v5899_v36  ;;  %p6222_p2 = por %p6221_p1, %p6220_p0 }
  0x29   : > { %p6223_p3 = pnand %p6222_p2, %p6216_p13 }
  0x2a   : > { %5363 = vmatpush3.bf16.msra.mxu0 %v5865_v12 }
  0x2b   : > { %5364 = vmatprep.subr.bf16.mxu0 %v5866_v13 }
  0x2e   : > { %5365 = vmatpush3.bf16.msra.mxu0 %v5867_v14 }
  0x2f   : > { %5366 = vmatprep.subr.bf16.mxu0 %v5868_v15 }
  0x32   : > { %5367 = vmatpush3.bf16.msra.mxu0 %v5869_v16 }
  0x33   : > { %5687 = vmatprep.subr.bf16.mxu0 %v5909_v37 }
  0x35   : > { %661 = vmatmul.mubr.bf16.vlgmr.msra.gmra.mxu0 %v5870_v17  ;;  %v5900_v17 = vld [vmem:[%s7565_s3] sm:$0xff]  }
  0x36   : > { %668 = vmatprep.mubr.bf16.mxu0 %v5873_v18  ;;  %5688 = vmatpush3.bf16.msra.mxu0 %v5909_v37 }
  0x37   : > { %5689 = vmatprep.subr.bf16.mxu0 %v5919_v38 }
  0x3a   : > { %5690 = vmatpush3.bf16.msra.mxu0 %v5919_v38 }
  0x3d   : > { %669 = vmatmul.mubr.bf16.gmra.mxu0 %v5875_v19 }
  0x3e   : > { %676 = vmatprep.mubr.bf16.mxu0 %v5876_v20 }
  0x45   : > { %677 = vmatmul.mubr.bf16.gmra.mxu0 %v5878_v21 }
  0x46   : > { %684 = vmatprep.mubr.bf16.mxu0 %v5879_v22  ;;  %v5901_v22 = vld [vmem:[%s7565_s3 + $0x88] sm:$0xff]  }
  0x4d   : > { %685 = vmatmul.mubr.bf16.gmra.mxu0 %v5881_v23 }
  0x4e   : > { %692 = vmatprep.mubr.bf16.mxu0 %v5882_v24 }
  0x55   : > { %693 = vmatmul.mubr.bf16.gmra.mxu0 %v5884_v25 }
  0x56   : > { %700 = vmatprep.mubr.bf16.mxu0 %v5885_v26 }
  0x5d   : > { %701 = vmatmul.mubr.bf16.gmra.mxu0 %v5887_v27 }
  0x5e   : > { %708 = vmatprep.mubr.bf16.mxu0 %v5888_v28 }
  0x65   : > { %709 = vmatmul.mubr.bf16.gmra.mxu0 %v5890_v29 }
  0x66   : > { %716 = vmatprep.mubr.bf16.mxu0 %v5891_v30  ;;  %v5902_v30 = vld [vmem:[%s7565_s3 + $0x80] sm:$0xff]  }
  0x6d   : > { %717 = vmatmul.mubr.bf16.gmra.mxu0 %v5893_v31 }
  0x6e   : > { %724 = vmatprep.mubr.bf16.mxu0 %v5894_v32 }
  0x75   : > { %725 = vmatmul.mubr.bf16.gmra.mxu0 %v5896_v33 }
  0xf5   : > { %v5368_v39 = vpop.f32.mrf.mxu0 }
  0xf7   : > { %v5369_v40 = vpop.f32.mrf.mxu0 }
  0xf8   : > { %v5370_v41 = vadd.f32 %v5369_v40, %v5368_v39  ;;  %v5903_v39 = vld [vmem:[%s7565_s3 + $0xa8] sm:$0xff]  }
  0xf9   : > { %v5371_v43 = vpop.f32.mrf.mxu0 }
  0xfa   : > { %v663_v45 = vadd.f32 %v5370_v41, %v6478_v42 }
  0xfb   : > { %v5372_v44 = vpop.f32.mrf.mxu0 }
  0xfc   : > { %v5373_v46 = vadd.f32 %v5372_v44, %v5371_v43  ;;  %v733_v50 = vmax.f32 %v663_v45, 0.0 }
  0xfd   : > { %v5374_v47 = vpop.f32.mrf.mxu0 }
  0xfe   : > { %v666_v48 = vadd.f32 %v5373_v46, %v6478_v42 }
  0xff   : > { %v5375_v49 = vpop.f32.mrf.mxu0 }
 0x100   : > { %v734_v51 = vmax.f32 %v666_v48, 0.0  ;;  %v5376_v52 = vadd.f32 %v5375_v49, %v5374_v47 }
 0x101   : > { %v5377_v53 = vpop.f32.mrf.mxu0 }
 0x102   : > { %v6482_v54 = vpack.c.bf16 %v734_v51, %v733_v50  ;;  %v671_v56 = vadd.f32 %v5376_v52, %v6478_v42 }
 0x103   : > { %v5378_v55 = vpop.f32.mrf.mxu0 }
 0x104   : > { %v5379_v57 = vadd.f32 %v5378_v55, %v5377_v53  ;;  %v772_v60 = vshll.u32 %v6482_v54, 16  ;;  %v735_v62 = vmax.f32 %v671_v56, 0.0  ;;  %v770_v6 = vshrl.u32 %v6482_v54, 16 }
 0x105   : > { %v5380_v58 = vpop.f32.mrf.mxu0  ;;  %v925_v29 = vrot.slane %v6482_v54, 3 }
 0x106   : > { %v674_v59 = vadd.f32 %v5379_v57, %v6478_v42  ;;  %v774_v2 = vrot.slane %v772_v60, 1  ;;  %v1006_v38 = vrot.slane %v770_v6, 3  ;;  %v1007_v41 = vrot.slane %v772_v60, 4 }
 0x107   : > { %v5381_v61 = vpop.f32.mrf.mxu0 }
 0x108   : > { %v736_v63 = vmax.f32 %v674_v59, 0.0  ;;  %v5382_v4 = vadd.f32 %v5381_v61, %v5380_v58  ;;  %v775_v9 = vor.u32 %v774_v2, %v770_v6  ;;  %v1008_v53 = vor.u32 %v1007_v41, %v1006_v38 }
 0x109   : > { %v5383_v0 = vpop.f32.mrf.mxu0 }
 0x10a   : > { %v6487_v1 = vpack.c.bf16 %v736_v63, %v735_v62  ;;  %v679_v13 = vadd.f32 %v5382_v4, %v6478_v42  ;;  %v5905_v63 = vld [vmem:[%s7565_s3 + $0x18] sm:$0xff]  }
 0x10b   : > { %v5384_v3 = vpop.f32.mrf.mxu0 }
 0x10c   : > { %v5385_v5 = vadd.f32 %v5384_v3, %v5383_v0  ;;  %v777_v7 = vshll.u32 %v6487_v1, 16  ;;  %v781_v11 = vshrl.u32 %v6487_v1, 16  ;;  %v737_v20 = vmax.f32 %v679_v13, 0.0 }
 0x10d   : > { %v5386_v8 = vpop.f32.mrf.mxu0  ;;  %v926_v26 = vrot.slane %v6487_v1, 3 }
 0x10e   : > { %v779_v10 = vrot.slane %v777_v7, 1  ;;  %v682_v14 = vadd.f32 %v5385_v5, %v6478_v42  ;;  %v1010_v31 = vrot.slane %v777_v7, 4 }
 0x10f   : > { %v5387_v12 = vpop.f32.mrf.mxu0  ;;  %v927_v35 = vsel %vm924_vm2, %v925_v29, %v926_v26 }
 0x110   : > { %v780_v15 = vsel %vm768_vm0, %v775_v9, %v779_v10  ;;  %v783_v16 = vor.u32 %v781_v11, %v779_v10  ;;  %v738_v21 = vmax.f32 %v682_v14, 0.0  ;;  %v5388_v24 = vadd.f32 %v5387_v12, %v5386_v8  ;;  %v5906_v9 = vld [vmem:[%s7565_s3 + $0x10] sm:$0xff]  }
 0x111   : > { %v5389_v18 = vpop.f32.mrf.mxu0  ;;  %5579 = vmatprep.mubr.msk.bf16.mxu1 %vm796_vm1, %v780_v15  ;;  %vm6276_vm0 = vmmov 0  }
 0x112   : > { %5580 = vmatmul.mubr.msk.bf16.vlgmr.msra.gmra.mxu1 %vm796_vm1, %v783_v16  ;;  %v6505_v28 = vpack.c.bf16 %v738_v21, %v737_v20  ;;  %v687_v33 = vadd.f32 %v5388_v24, %v6478_v42 }
 0x113   : > { %5584 = vmatpush3.bf16.msra.mxu1 %v5899_v36  ;;  %v5390_v19 = vpop.f32.mrf.mxu0  ;;  %5587 = vmatprep.mubr.msk.bf16.mxu1 %vm796_vm1, %v6482_v54  ;;  %v1009_v36 = vrot.slane %v781_v11, 3  ;;  %v5904_v54 = vld [vmem:[%s7565_s3 + $0xa0] sm:$0xff]  }
 0x114   : > { %5585 = vmatprep.subr.bf16.mxu1 %v5900_v17  ;;  %v5391_v25 = vadd.f32 %v5390_v19, %v5389_v18  ;;  %v928_v40 = vrot.slane %v6505_v28, 3  ;;  %v6524_v46 = vshrl.u32 %v6505_v28, 16  ;;  %v6527_v47 = vshll.u32 %v6505_v28, 16 }
 0x115   : > { %v5392_v23 = vpop.f32.mrf.mxu0  ;;  %v739_v48 = vmax.f32 %v687_v33, 0.0  ;;  %v1011_v50 = vor.u32 %v1010_v31, %v1009_v36  ;;  %v1100_v8 = vrot.slane %v6505_v28, 2 }
 0x116   : > { %v690_v34 = vadd.f32 %v5391_v25, %v6478_v42  ;;  %v929_v52 = vsel %vm924_vm2, %v926_v26, %v928_v40  ;;  %v1016_v58 = vrot.slane %v6524_v46, 3  ;;  %v1019_v59 = vrot.slane %v6527_v47, 4 }
 0x117   : > { %5586 = vmatpush3.bf16.msra.mxu1 %v5900_v17  ;;  %v5393_v27 = vpop.f32.mrf.mxu0  ;;  %v1012_v61 = vsel %vm1005_vm3, %v1008_v53, %v1011_v50  ;;  %v5907_v17 = vld [vmem:[%s7565_s3 + $0x38] sm:$0xff]   ;;  %v1181_v18 = vrot.slane %v6524_v46, 2  ;;  %v1182_v19 = vrot.slane %v6527_v47, 3 }
 0x118   : > { %5591 = vmatprep.subr.bf16.mxu1 %v5901_v22  ;;  %v5394_v43 = vadd.f32 %v5393_v27, %v5392_v23  ;;  %v740_v49 = vmax.f32 %v690_v34, 0.0  ;;  %v1020_v2 = vor.u32 %v1019_v59, %v1016_v58  ;;  %v5908_v27 = vld [vmem:[%s7565_s3 + $0x30] sm:$0xff]   ;;  %v1359_v59 = vrot.slane %v6524_v46, 5 }
 0x119   : > { %v5395_v32 = vpop.f32.mrf.mxu0  ;;  %v1183_v26 = vor.u32 %v1182_v19, %v1181_v18 }
 0x11a   : > { %5588 = vmatmul.mubr.msk.bf16.vlgmr.msra.gmra.mxu1 %vm796_vm1, %v6487_v1  ;;  %v695_v55 = vadd.f32 %v5394_v43, %v6478_v42  ;;  %v6541_v60 = vpack.c.bf16 %v740_v49, %v739_v48  ;;  %v1021_v11 = vsel %vm1005_vm3, %v1011_v50, %v1020_v2  ;;  %v1278_v48 = vrot.slane %v6505_v28, 5  ;;  %v5911_v50 = vld [vmem:[%s7565_s3 + $0x90] sm:$0xff]  }
 0x11b   : > { %5592 = vmatpush3.bf16.msra.mxu1 %v5901_v22  ;;  %v5396_v37 = vpop.f32.mrf.mxu0  ;;  %5595 = vmatprep.mubr.msk.bf16.mxu1 %vm796_vm1, %v927_v35  ;;  %v5910_v35 = vld [vmem:[%s7565_s3 + $0x98] sm:$0xff]  }
 0x11c   : > { %5593 = vmatprep.subr.bf16.mxu1 %v5902_v30  ;;  %v5397_v44 = vadd.f32 %v5396_v37, %v5395_v32  ;;  %v741_v0 = vmax.f32 %v695_v55, 0.0  ;;  %v1101_v4 = vrot.slane %v6541_v60, 2  ;;  %v1185_v5 = vshrl.u32 %v6541_v60, 16 }
 0x11d   : > { %v6521_v45 = vpop.f32.mrf.mxu0  ;;  %v1188_v6 = vshll.u32 %v6541_v60, 16  ;;  %v1279_v43 = vrot.slane %v6541_v60, 5 }
 0x11e   : > { %v698_v56 = vadd.f32 %v5397_v44, %v6478_v42  ;;  %v1102_v13 = vsel %vm1099_vm4, %v1100_v8, %v1101_v4  ;;  %v1187_v14 = vrot.slane %v1185_v5, 2 }
 0x11f   : > { %5594 = vmatpush3.bf16.msra.mxu1 %v5902_v30  ;;  %v6529_v51 = vpop.f32.mrf.mxu0  ;;  %v1190_v15 = vrot.slane %v1188_v6, 3  ;;  %v1280_v28 = vsel %vm1277_vm6, %v1278_v48, %v1279_v43 }
 0x120   : > { %5599 = vmatprep.subr.bf16.mxu1 %v5903_v39  ;;  %v742_v1 = vmax.f32 %v698_v56, 0.0  ;;  %v5400_v40 = vadd.f32 %v6529_v51, %v6521_v45  ;;  %v1362_v51 = vrot.slane %v1185_v5, 5 }
 0x121   : > { %v6537_v57 = vpop.f32.mrf.mxu0  ;;  %v1191_v24 = vor.u32 %v1190_v15, %v1187_v14  ;;  %v5913_v14 = vld [vmem:[%s7565_s3 + $0xb0] sm:$0xff]  }
 0x122   : > { %5596 = vmatmul.mubr.msk.bf16.vlgmr.msra.gmra.mxu1 %vm796_vm1, %v929_v52  ;;  %v6560_v10 = vpack.c.bf16 %v742_v1, %v741_v0  ;;  %v703_v56 = vadd.f32 %v5400_v40, %v6478_v42  ;;  %v1360_v0 = vrot.slane %v6527_v47, 6  ;;  %v5916_v40 = vld [vmem:[%s7565_s3 + $0x68] sm:$0xff]  }
 0x123   : > { %5600 = vmatpush3.bf16.msra.mxu1 %v5903_v39  ;;  %v5402_v62 = vpop.f32.mrf.mxu0  ;;  %5603 = vmatprep.mubr.msk.bf16.mxu1 %vm796_vm1, %v1012_v61  ;;  %v1192_v33 = vsel %vm1180_vm5, %v1183_v26, %v1191_v24 }
 0x124   : > { %5601 = vmatprep.subr.bf16.mxu1 %v5904_v54  ;;  %v1103_v20 = vrot.slane %v6560_v10, 2  ;;  %v6577_v22 = vshrl.u32 %v6560_v10, 16  ;;  %v6580_v23 = vshll.u32 %v6560_v10, 16  ;;  %v5403_v41 = vadd.f32 %v5402_v62, %v6537_v57 }
 0x125   : > { %v6549_v3 = vpop.f32.mrf.mxu0  ;;  %v1281_v2 = vrot.slane %v6560_v10, 5  ;;  %v743_v5 = vmax.f32 %v703_v56, 0.0  ;;  %v1361_v47 = vor.u32 %v1360_v0, %v1359_v59 }
 0x126   : > { %v1104_v29 = vsel %vm1099_vm4, %v1101_v4, %v1103_v20  ;;  %v1196_v30 = vrot.slane %v6577_v22, 2  ;;  %v1199_v31 = vrot.slane %v6580_v23, 3  ;;  %v706_v57 = vadd.f32 %v5403_v41, %v6478_v42 }
 0x127   : > { %5602 = vmatpush3.bf16.msra.mxu1 %v5904_v54  ;;  %v6554_v7 = vpop.f32.mrf.mxu0  ;;  %v1363_v54 = vrot.slane %v1188_v6, 6  ;;  %v1366_v18 = vrot.slane %v6577_v22, 5  ;;  %v1529_v41 = vrot.slane %v6577_v22, 4  ;;  %v1707_v0 = vrot.slane %v6577_v22, 7  ;;  %v5923_v22 = vld [vmem:[%s7565_s3 + $0x58] sm:$0xff]  }
 0x128   : > { %5607 = vmatprep.subr.bf16.mxu1 %v5905_v63  ;;  %v1200_v38 = vor.u32 %v1199_v31, %v1196_v30  ;;  %v744_v6 = vmax.f32 %v706_v57, 0.0  ;;  %v5406_v46 = vadd.f32 %v6554_v7, %v6549_v3  ;;  %v1367_v3 = vrot.slane %v6580_v23, 6 }
 0x129   : > { %v6563_v12 = vpop.f32.mrf.mxu0  ;;  %v1364_v4 = vor.u32 %v1363_v54, %v1362_v51 }
 0x12a   : > { %5604 = vmatmul.mubr.msk.bf16.vlgmr.msra.gmra.mxu1 %vm796_vm1, %v1021_v11  ;;  %v1201_v45 = vsel %vm1180_vm5, %v1191_v24, %v1200_v38  ;;  %v6630_v7 = vpack.c.bf16 %v744_v6, %v743_v5  ;;  %v711_v20 = vadd.f32 %v5406_v46, %v6478_v42  ;;  %v5914_v24 = vld [vmem:[%s7565_s3 + $0x48] sm:$0xff]   ;;  %v1368_v26 = vor.u32 %v1367_v3, %v1366_v18 }
 0x12b   : > { %5608 = vmatpush3.bf16.msra.mxu1 %v5905_v63  ;;  %5611 = vmatprep.mubr.msk.bf16.mxu1 %vm796_vm1, %v1102_v13  ;;  %v6568_v16 = vpop.f32.mrf.mxu0  ;;  %v5912_v63 = vld [vmem:[%s7565_s3 + $0xb8] sm:$0xff]  }
 0x12c   : > { %5609 = vmatprep.subr.bf16.mxu1 %v5906_v9  ;;  %v5409_v11 = vadd.f32 %v6568_v16, %v6563_v12  ;;  %v1365_v12 = vsel %vm1358_vm7, %v1361_v47, %v1364_v4  ;;  %v1536_v30 = vshll.u32 %v6630_v7, 16  ;;  %v745_v31 = vmax.f32 %v711_v20, 0.0  ;;  %v5924_v47 = vld [vmem:[%s7565_s3 + $0x50] sm:$0xff]  }
 0x12d   : > { %v5410_v21 = vpop.f32.mrf.mxu0  ;;  %v1627_v57 = vrot.slane %v6630_v7, 7 }
 0x12e   : > { %v1538_v38 = vrot.slane %v1536_v30, 5 }
 0x12f   : > { %5610 = vmatpush3.bf16.msra.mxu1 %v5906_v9  ;;  %v5411_v25 = vpop.f32.mrf.mxu0 }
 0x130   : > { %5615 = vmatprep.subr.bf16.mxu1 %v5907_v17  ;;  %v5412_v36 = vadd.f32 %v5411_v25, %v5410_v21  ;;  %v714_v21 = vadd.f32 %v5409_v11, %v6478_v42 }
 0x131   : > { %v5413_v32 = vpop.f32.mrf.mxu0 }
 0x132   : > { %5612 = vmatmul.mubr.msk.bf16.vlgmr.msra.gmra.mxu1 %vm796_vm1, %v1104_v29  ;;  %v719_v49 = vadd.f32 %v5412_v36, %v6478_v42  ;;  %v1533_v29 = vshrl.u32 %v6630_v7, 16 }
 0x133   : > { %5616 = vmatpush3.bf16.msra.mxu1 %v5907_v17  ;;  %5619 = vmatprep.mubr.msk.bf16.mxu1 %vm796_vm1, %v1192_v33  ;;  %v5414_v34 = vpop.f32.mrf.mxu0  ;;  %v1282_v17 = vsel %vm1277_vm6, %v1279_v43, %v1281_v2  ;;  %v1448_v33 = vrot.slane %v6560_v10, 4  ;;  %v1530_v43 = vrot.slane %v6580_v23, 5 }
 0x134   : > { %5617 = vmatprep.subr.bf16.mxu1 %v5908_v27  ;;  %v5415_v37 = vadd.f32 %v5414_v34, %v5413_v32  ;;  %v747_v61 = vmax.f32 %v719_v49, 0.0  ;;  %v746_v32 = vmax.f32 %v714_v21, 0.0  ;;  %v5915_v34 = vld [vmem:[%s7565_s3 + $0x40] sm:$0xff]  }
 0x135   : > { %v5416_v39 = vpop.f32.mrf.mxu0 }
 0x136   : > { %v722_v52 = vadd.f32 %v5415_v37, %v6478_v42  ;;  %v1535_v37 = vrot.slane %v1533_v29, 4 }
 0x137   : > { %5618 = vmatpush3.bf16.msra.mxu1 %v5908_v27  ;;  %v5417_v44 = vpop.f32.mrf.mxu0  ;;  %v1449_v27 = vrot.slane %v6630_v7, 4 }
 0x138   : > { %5623 = vmatprep.subr.bf16.mxu1 %v5910_v35  ;;  %v5418_v53 = vadd.f32 %v5417_v44, %v5416_v39  ;;  %v748_v62 = vmax.f32 %v722_v52, 0.0  ;;  %v6657_v39 = vpack.c.bf16 %v746_v32, %v745_v31  ;;  %v1539_v49 = vor.u32 %v1538_v38, %v1535_v37  ;;  %v5928_v37 = vld [vmem:[%s7565_s3 + $0xf0] sm:$0xff]  }
 0x139   : > { %v5419_v55 = vpop.f32.mrf.mxu0  ;;  %v1450_v36 = vsel %vm1447_vm9, %v1448_v33, %v1449_v27  ;;  %v1531_v52 = vor.u32 %v1530_v43, %v1529_v41  ;;  %v5927_v33 = vld [vmem:[%s7565_s3 + $0xf8] sm:$0xff]   ;;  %v6275_v41 = vmov 0.0   ;;  %v5930_v43 = vld [vmem:[%s7567_s5 + $0x10] sm:$0xff]  }
 0x13a   : > { %5620 = vmatmul.mubr.msk.bf16.vlgmr.msra.gmra.mxu1 %vm796_vm1, %v1201_v45  ;;  %v727_v58 = vadd.f32 %v5418_v53, %v6478_v42  ;;  %v6622_v13 = vpack.c.bf16 %v748_v62, %v747_v61  ;;  %v1451_v44 = vrot.slane %v6657_v39, 4  ;;  %v6667_v48 = vshll.u32 %v6657_v39, 16  ;;  %v5917_v53 = vld [vmem:[%s7565_s3 + $0x60] sm:$0xff]   ;;  %v5921_v62 = vld [vmem:[%s7565_s3 + $0xe8] sm:$0xff]   ;;  %5703 = vmatprep.subr.bf16.mxu0 %v6275_v41 }
 0x13b   : > { %5624 = vmatpush3.bf16.msra.mxu1 %v5910_v35  ;;  %5627 = vmatprep.mubr.msk.bf16.mxu1 %vm796_vm1, %v1280_v28  ;;  %v5420_v60 = vpop.f32.mrf.mxu0  ;;  %v1369_v35 = vsel %vm1358_vm7, %v1364_v4, %v1368_v26  ;;  %v1540_v54 = vsel %vm1528_vm10, %v1531_v52, %v1539_v49  ;;  %v1626_v28 = vrot.slane %v6560_v10, 7  ;;  %v1708_v61 = vrot.slane %v1533_v29, 7  ;;  %v5935_v52 = vld [vmem:[%s7567_s5 + $0x28] sm:$0xff]  }
 0x13c   : > { %5625 = vmatprep.subr.bf16.mxu1 %v5911_v50  ;;  %v5421_v1 = vadd.f32 %v5420_v60, %v5419_v55  ;;  %v749_v8 = vmax.f32 %v727_v58, 0.0  ;;  %v1970_v19 = vrot.slane %v6622_v13, 1  ;;  %v1452_v45 = vsel %vm1447_vm9, %v1449_v27, %v1451_v44  ;;  %v5918_v55 = vld [vmem:[%s7565_s3 + $0xc8] sm:$0xff]   ;;  %v5920_v58 = vld [vmem:[%s7565_s3 + $0xc0] sm:$0xff]   ;;  %v5931_v44 = vld [vmem:[%s7567_s5 + $0x38] sm:$0xff]  }
 0x13d   : > { %v1547_v51 = vrot.slane %v6667_v48, 5  ;;  %v1628_v60 = vsel %vm1625_vm11, %v1626_v28, %v1627_v57  ;;  %v1629_v10 = vrot.slane %v6657_v39, 7  ;;  %v1877_v46 = vshrl.u32 %v6622_v13, 16 }
 0x13e   : > { %v730_v9 = vadd.f32 %v5421_v1, %v6478_v42  ;;  %v5922_v1 = vld [vmem:[%s7565_s3 + $0xe0] sm:$0xff]   ;;  %v1880_v11 = vshll.u32 %v6622_v13, 16  ;;  %v1874_v18 = vrot.slane %v6667_v48, 7 }
 0x13f   : > { %5626 = vmatpush3.bf16.msra.mxu1 %v5911_v50  ;;  %v6670_v50 = vshrl.u32 %v6657_v39, 16  ;;  %v1630_v2 = vsel %vm1625_vm11, %v1627_v57, %v1629_v10  ;;  %v1879_v3 = vrot.slane %v1877_v46, 6 }
 0x140   : > { %5631 = vmatprep.subr.bf16.mxu1 %v5912_v63  ;;  %v750_v15 = vmax.f32 %v730_v9, 0.0  ;;  %v1793_v9 = vrot.slane %v6622_v13, 6  ;;  %v1882_v7 = vrot.slane %v1880_v11, 7  ;;  %v5925_v13 = vld [vmem:[%s7565_s3 + $0x78] sm:$0xff]   ;;  %v2050_v31 = vrot.slane %v1880_v11, 2 }
 0x141   : > { %v1544_v23 = vrot.slane %v6670_v50, 4  ;;  %v1711_v4 = vrot.slane %v6670_v50, 7 }
 0x142   : > { %5628 = vmatmul.mubr.msk.bf16.vlgmr.msra.gmra.mxu1 %vm796_vm1, %v1282_v17  ;;  %v6634_v16 = vpack.c.bf16 %v750_v15, %v749_v8  ;;  %v1792_v8 = vrot.slane %v6657_v39, 6  ;;  %v1873_v15 = vrot.slane %v6670_v50, 6  ;;  %v5934_v50 = vld [vmem:[%s7567_s5] sm:$0xff]  }
 0x143   : > { %5632 = vmatpush3.bf16.msra.mxu1 %v5912_v63  ;;  %5635 = vmatprep.mubr.msk.bf16.mxu1 %vm796_vm1, %v1365_v12  ;;  %v1548_v56 = vor.u32 %v1547_v51, %v1544_v23  ;;  %v1709_v63 = vor.u32 %v1708_v61, %v1536_v30  ;;  %v1712_v6 = vor.u32 %v1711_v4, %v6667_v48  ;;  %v2049_v30 = vrot.slane %v1877_v46, 1  ;;  %v5932_v48 = vld [vmem:[%s7567_s5 + $0x8] sm:$0xff]  }
 0x144   : > { %5633 = vmatprep.subr.bf16.mxu1 %v5913_v14  ;;  %v1971_v25 = vrot.slane %v6634_v16, 1  ;;  %v1794_v17 = vsel %vm1791_vm13, %v1792_v8, %v1793_v9  ;;  %v1886_v12 = vshrl.u32 %v6634_v16, 16  ;;  %v1795_v20 = vrot.slane %v6634_v16, 6 }
 0x145   : > { %v1549_v59 = vsel %vm1528_vm10, %v1539_v49, %v1548_v56  ;;  %v1710_v5 = vsel %vm1706_vm12, %v1707_v0, %v1709_v63  ;;  %v1875_v21 = vor.u32 %v1874_v18, %v1873_v15  ;;  %v5933_v49 = vld [vmem:[%s7567_s5 + $0x30] sm:$0xff]  }
 0x146   : > { %v1972_v42 = vsel %vm1969_vm8, %v1970_v19, %v1971_v25  ;;  %v1889_v19 = vshll.u32 %v6634_v16, 16  ;;  %v1796_v26 = vsel %vm1791_vm13, %v1793_v9, %v1795_v20  ;;  %v1888_v27 = vrot.slane %v1886_v12, 6 }
 0x147   : > { %5634 = vmatpush3.bf16.msra.mxu1 %v5913_v14  ;;  %5691 = vmatprep.mubr.msk.bf16.mxu0 %vm796_vm1, %v1972_v42  ;;  %v1713_v14 = vsel %vm1706_vm12, %v1708_v61, %v1712_v6  ;;  %v2052_v16 = vrot.slane %v1886_v12, 1 }
 0x148   : > { %5639 = vmatprep.subr.bf16.mxu1 %v5914_v24  ;;  %5692 = vmatmul.mubr.msk.bf16.vlgmr.msra.gmra.mxu0 %vm796_vm1, %v1971_v25  ;;  %v5926_v25 = vld [vmem:[%s7565_s3 + $0x70] sm:$0xff]   ;;  %v1891_v29 = vrot.slane %v1889_v19, 7  ;;  %v2053_v32 = vrot.slane %v1889_v19, 2 }
 0x149   : > { %5704 = vmatpush3.bf16.msra.mxu0 %v5931_v44  ;;  %5711 = vmatprep.mubr.msk.bf16.mxu0 %vm6276_vm0, %v6275_v41 }
 0x14a   : > { %5636 = vmatmul.mubr.msk.bf16.vlgmr.msra.gmra.mxu1 %vm796_vm1, %v1369_v35  ;;  %v2051_v35 = vor.u32 %v2050_v31, %v2049_v30  ;;  %5705 = vmatprep.subr.bf16.mxu0 %v6275_v41 }
 0x14b   : > { %5640 = vmatpush3.bf16.msra.mxu1 %v5914_v24  ;;  %5643 = vmatprep.mubr.msk.bf16.mxu1 %vm796_vm1, %v1450_v36  ;;  %v1883_v24 = vor.u32 %v1882_v7, %v1879_v3  ;;  %v2054_v36 = vor.u32 %v2053_v32, %v2052_v16 }
 0x14c   : > { %5641 = vmatprep.subr.bf16.mxu1 %v5915_v34 }
 0x14d   : > { %v1884_v42 = vsel %vm1872_vm14, %v1875_v21, %v1883_v24  ;;  %v2055_v39 = vsel %vm2048_vm15, %v2051_v35, %v2054_v36  ;;  %5706 = vmatpush3.bf16.msra.mxu0 %v5933_v49 }
 0x14e   : > { %5707 = vmatprep.subr.bf16.mxu0 %v6275_v41 }
 0x14f   : > { %5642 = vmatpush3.bf16.msra.mxu1 %v5915_v34  ;;  %v1892_v34 = vor.u32 %v1891_v29, %v1888_v27 }
 0x150   : > { %5647 = vmatprep.subr.bf16.mxu1 %v5916_v40 }
 0x151   : > { %v1893_v38 = vsel %vm1872_vm14, %v1883_v24, %v1892_v34  ;;  %5708 = vmatpush3.bf16.msra.mxu0 %v5935_v52 }
 0x152   : > { %5644 = vmatmul.mubr.msk.bf16.vlgmr.msra.gmra.mxu1 %vm796_vm1, %v1452_v45  ;;  %5709 = vmatprep.subr.bf16.mxu0 %v6275_v41  ;;  %v5937_v45 = vld [vmem:[%s7567_s5 + $0x20] sm:$0xff]  }
 0x153   : > { %5648 = vmatpush3.bf16.msra.mxu1 %v5916_v40  ;;  %5651 = vmatprep.mubr.msk.bf16.mxu1 %vm796_vm1, %v1540_v54  ;;  %v5929_v40 = vld [vmem:[%s7567_s5 + $0x18] sm:$0xff]  }
 0x154   : > { %5649 = vmatprep.subr.bf16.mxu1 %v5917_v53 }
 0x155   : > { %5710 = vmatpush3.bf16.msra.mxu0 %v5937_v45 }
 0x156   : > { %5727 = vmatprep.subr.bf16.mxu0 %v6275_v41 }
 0x157   : > { %5650 = vmatpush3.bf16.msra.mxu1 %v5917_v53 }
 0x158   : > { %5655 = vmatprep.subr.bf16.mxu1 %v5918_v55 }
 0x15a   : > { %5652 = vmatmul.mubr.msk.bf16.vlgmr.msra.gmra.mxu1 %vm796_vm1, %v1549_v59 }
 0x15b   : > { %5656 = vmatpush3.bf16.msra.mxu1 %v5918_v55  ;;  %5659 = vmatprep.mubr.msk.bf16.mxu1 %vm796_vm1, %v1628_v60 }
 0x15c   : > { %5657 = vmatprep.subr.bf16.mxu1 %v5920_v58 }
 0x15f   : > { %5658 = vmatpush3.bf16.msra.mxu1 %v5920_v58 }
 0x160   : > { %5663 = vmatprep.subr.bf16.mxu1 %v5921_v62 }
 0x162   : > { %5660 = vmatmul.mubr.msk.bf16.vlgmr.msra.gmra.mxu1 %vm796_vm1, %v1630_v2 }
 0x163   : > { %5664 = vmatpush3.bf16.msra.mxu1 %v5921_v62  ;;  %5667 = vmatprep.mubr.msk.bf16.mxu1 %vm796_vm1, %v1710_v5 }
 0x164   : > { %5665 = vmatprep.subr.bf16.mxu1 %v5922_v1 }
 0x167   : > { %5666 = vmatpush3.bf16.msra.mxu1 %v5922_v1 }
 0x168   : > { %5671 = vmatprep.subr.bf16.mxu1 %v5923_v22 }
 0x16a   : > { %5668 = vmatmul.mubr.msk.bf16.vlgmr.msra.gmra.mxu1 %vm796_vm1, %v1713_v14 }
 0x16b   : > { %5672 = vmatpush3.bf16.msra.mxu1 %v5923_v22  ;;  %5675 = vmatprep.mubr.msk.bf16.mxu1 %vm796_vm1, %v1794_v17 }
 0x16c   : > { %5673 = vmatprep.subr.bf16.mxu1 %v5924_v47 }
 0x16f   : > { %5674 = vmatpush3.bf16.msra.mxu1 %v5924_v47 }
 0x170   : > { %5679 = vmatprep.subr.bf16.mxu1 %v5925_v13 }
 0x172   : > { %5676 = vmatmul.mubr.msk.bf16.vlgmr.msra.gmra.mxu1 %vm796_vm1, %v1796_v26 }
 0x173   : > { %5680 = vmatpush3.bf16.msra.mxu1 %v5925_v13  ;;  %5683 = vmatprep.mubr.msk.bf16.mxu1 %vm796_vm1, %v1884_v42 }
 0x174   : > { %5681 = vmatprep.subr.bf16.mxu1 %v5926_v25 }
 0x177   : > { %5682 = vmatpush3.bf16.msra.mxu1 %v5926_v25 }
 0x178   : > { %5695 = vmatprep.subr.bf16.mxu1 %v5927_v33 }
 0x17a   : > { %5684 = vmatmul.mubr.msk.bf16.vlgmr.msra.gmra.mxu1 %vm796_vm1, %v1893_v38 }
 0x17b   : > { %5696 = vmatpush3.bf16.msra.mxu1 %v5927_v33  ;;  %5699 = vmatprep.mubr.msk.bf16.mxu1 %vm796_vm1, %v2055_v39 }
 0x17c   : > { %5697 = vmatprep.subr.bf16.mxu1 %v5928_v37 }
 0x17f   : > { %5698 = vmatpush3.bf16.msra.mxu1 %v5928_v37 }
 0x180   : > { %5715 = vmatprep.subr.bf16.mxu1 %v6275_v41 }
 0x182   : > { %5700 = vmatmul.mubr.msk.bf16.vlgmr.msra.gmra.mxu1 %vm796_vm1, %v2054_v36  ;;  %vm2191_vm1 = vcmask 523264  }
 0x183   : > { %5716 = vmatpush3.bf16.msra.mxu1 %v5929_v40  ;;  %5723 = vmatprep.mubr.msk.bf16.mxu1 %vm6276_vm0, %v6275_v41 }
 0x184   : > { %5717 = vmatprep.subr.bf16.mxu1 %v6275_v41 }
 0x187   : > { %5718 = vmatpush3.bf16.msra.mxu1 %v5930_v43 }
 0x188   : > { %5719 = vmatprep.subr.bf16.mxu1 %v6275_v41 }
 0x18b   : > { %5720 = vmatpush3.bf16.msra.mxu1 %v5932_v48 }
 0x18c   : > { %5721 = vmatprep.subr.bf16.mxu1 %v6275_v41 }
 0x18f   : > { %5722 = vmatpush3.bf16.msra.mxu1 %v5934_v50 }
 0x190   : > { %5739 = vmatprep.subr.bf16.mxu1 %v6275_v41 }
 0x1d2   : > { %v5581_v53 = vpop.f32.mrf.mxu1 }
 0x1d4   : > { %v837_v23 = vpop.f32.mrf.mxu1 }
 0x1d6   : > { %v5582_v51 = vpop.f32.mrf.mxu1 }
 0x1d8   : > { %v840_v54 = vpop.f32.mrf.mxu1 }
 0x1da   : > { %v5589_v55 = vpop.f32.mrf.mxu1 }
 0x1db   : > { %v911_v56 = vadd.f32 %v5589_v55, %v5581_v53 }
 0x1dc   : > { %v902_v57 = vpop.f32.mrf.mxu1 }
 0x1dd   : > { %v903_v28 = vadd.f32 %v902_v57, %v837_v23 }
 0x1de   : > { %v5590_v58 = vpop.f32.mrf.mxu1 }
 0x1df   : > { %v914_v59 = vadd.f32 %v5590_v58, %v5582_v51 }
 0x1e0   : > { %v905_v60 = vpop.f32.mrf.mxu1 }
 0x1e1   : > { %v906_v1 = vadd.f32 %v905_v60, %v840_v54 }
 0x1e2   : > { %v5597_v61 = vpop.f32.mrf.mxu1 }
 0x1e3   : > { %v999_v62 = vadd.f32 %v5597_v61, %v911_v56 }
 0x1e4   : > { %v982_v10 = vpop.f32.mrf.mxu1 }
 0x1e5   : > { %v997_v63 = vadd.f32 %v982_v10, %v903_v28 }
 0x1e6   : > { %v5598_v0 = vpop.f32.mrf.mxu1 }
 0x1e7   : > { %v1000_v2 = vadd.f32 %v5598_v0, %v914_v59 }
 0x1e8   : > { %v985_v4 = vpop.f32.mrf.mxu1 }
 0x1e9   : > { %v998_v5 = vadd.f32 %v985_v4, %v906_v1 }
 0x1ea   : > { %v5605_v22 = vpop.f32.mrf.mxu1 }
 0x1eb   : > { %v1091_v6 = vadd.f32 %v5605_v22, %v999_v62 }
 0x1ec   : > { %v1074_v8 = vpop.f32.mrf.mxu1 }
 0x1ed   : > { %v1089_v9 = vadd.f32 %v1074_v8, %v997_v63 }
 0x1ee   : > { %v5606_v46 = vpop.f32.mrf.mxu1 }
 0x1ef   : > { %v1092_v11 = vadd.f32 %v5606_v46, %v1000_v2 }
 0x1f0   : > { %v1077_v47 = vpop.f32.mrf.mxu1 }
 0x1f1   : > { %v1090_v14 = vadd.f32 %v1077_v47, %v998_v5 }
 0x1f2   : > { %v5613_v15 = vpop.f32.mrf.mxu1 }
 0x1f3   : > { %v1174_v17 = vadd.f32 %v5613_v15, %v1091_v6 }
 0x1f4   : > { %v1157_v18 = vpop.f32.mrf.mxu1 }
 0x1f5   : > { %v1172_v45 = vadd.f32 %v1157_v18, %v1089_v9 }
 0x1f6   : > { %v5614_v3 = vpop.f32.mrf.mxu1 }
 0x1f7   : > { %v1175_v7 = vadd.f32 %v5614_v3, %v1092_v11 }
 0x1f8   : > { %v1160_v13 = vpop.f32.mrf.mxu1 }
 0x1f9   : > { %v1173_v55 = vadd.f32 %v1160_v13, %v1090_v14 }
 0x1fa   : > { %v5621_v12 = vpop.f32.mrf.mxu1 }
 0x1fb   : > { %v1271_v19 = vadd.f32 %v5621_v12, %v1174_v17 }
 0x1fc   : > { %v1254_v20 = vpop.f32.mrf.mxu1 }
 0x1fd   : > { %v1269_v51 = vadd.f32 %v1254_v20, %v1172_v45 }
 0x1fe   : > { %v5622_v21 = vpop.f32.mrf.mxu1 }
 0x1ff   : > { %v1272_v24 = vadd.f32 %v5622_v21, %v1175_v7 }
 0x200   : > { %v1257_v25 = vpop.f32.mrf.mxu1 }
 0x201   : > { %v1270_v58 = vadd.f32 %v1257_v25, %v1173_v55 }
 0x202   : > { %v5629_v26 = vpop.f32.mrf.mxu1 }
 0x203   : > { %v1352_v27 = vadd.f32 %v5629_v26, %v1271_v19 }
 0x204   : > { %v1335_v29 = vpop.f32.mrf.mxu1 }
 0x205   : > { %v1350_v56 = vadd.f32 %v1335_v29, %v1269_v51 }
 0x206   : > { %v5630_v30 = vpop.f32.mrf.mxu1 }
 0x207   : > { %v1353_v59 = vadd.f32 %v5630_v30, %v1272_v24 }
 0x208   : > { %v1338_v42 = vpop.f32.mrf.mxu1  ;;  %v5693_v14 = vpop.f32.mrf.mxu0 }
 0x209   : > { %v1351_v10 = vadd.f32 %v1338_v42, %v1270_v58  ;;  %v5936_v58 = vld [vmem:[%s7567_s5 + $0x78] sm:$0xff]  }
 0x20a   : > { %v5637_v31 = vpop.f32.mrf.mxu1  ;;  %v2025_v24 = vpop.f32.mrf.mxu0 }
 0x20b   : > { %v1439_v57 = vadd.f32 %v5637_v31, %v1352_v27 }
 0x20c   : > { %v1422_v16 = vpop.f32.mrf.mxu1 }
 0x20d   : > { %v1437_v60 = vadd.f32 %v1422_v16, %v1350_v56 }
 0x20e   : > { %v5638_v32 = vpop.f32.mrf.mxu1 }
 0x20f   : > { %v1440_v63 = vadd.f32 %v5638_v32, %v1353_v59  ;;  %v5694_v32 = vpop.f32.mrf.mxu0 }
 0x210   : > { %v1425_v33 = vpop.f32.mrf.mxu1 }
 0x211   : > { %v1438_v4 = vadd.f32 %v1425_v33, %v1351_v10 }
 0x212   : > { %v5645_v34 = vpop.f32.mrf.mxu1 }
 0x213   : > { %v1522_v61 = vadd.f32 %v5645_v34, %v1439_v57 }
 0x214   : > { %v1505_v35 = vpop.f32.mrf.mxu1 }
 0x215   : > { %v1520_v0 = vadd.f32 %v1505_v35, %v1437_v60 }
 0x216   : > { %v5646_v36 = vpop.f32.mrf.mxu1 }
 0x217   : > { %v1523_v5 = vadd.f32 %v5646_v36, %v1440_v63 }
 0x218   : > { %v1508_v37 = vpop.f32.mrf.mxu1 }
 0x219   : > { %v1521_v9 = vadd.f32 %v1508_v37, %v1438_v4  ;;  %v5108_v37 = vld [vmem:[%s7566_s4] ss:$0 sm:$0xff] }
 0x21a   : > { %v5653_v38 = vpop.f32.mrf.mxu1 }
 0x21b   : > { %v1619_v1 = vadd.f32 %v5653_v38, %v1522_v61 }
 0x21c   : > { %v1602_v39 = vpop.f32.mrf.mxu1 }
 0x21d   : > { %v1617_v22 = vadd.f32 %v1602_v39, %v1520_v0 }
 0x21e   : > { %v5654_v40 = vpop.f32.mrf.mxu1 }
 0x21f   : > { %v1620_v46 = vadd.f32 %v5654_v40, %v1523_v5  ;;  %v5938_v5 = vld [vmem:[%s7567_s5 + $0x70] sm:$0xff]  }
 0x220   : > { %v1605_v43 = vpop.f32.mrf.mxu1 }
 0x221   : > { %v1618_v17 = vadd.f32 %v1605_v43, %v1521_v9  ;;  %v2028_v43 = vpop.f32.mrf.mxu0 }
 0x222   : > { %v5661_v44 = vpop.f32.mrf.mxu1 }
 0x223   : > { %v1700_v6 = vadd.f32 %v5661_v44, %v1619_v1 }
 0x224   : > { %v1683_v48 = vpop.f32.mrf.mxu1 }
 0x225   : > { %v1698_v11 = vadd.f32 %v1683_v48, %v1617_v22 }
 0x226   : > { %v5662_v49 = vpop.f32.mrf.mxu1 }
 0x227   : > { %v1701_v18 = vadd.f32 %v5662_v49, %v1620_v46 }
 0x228   : > { %v1686_v50 = vpop.f32.mrf.mxu1 }
 0x229   : > { %v1699_v12 = vadd.f32 %v1686_v50, %v1618_v17 }
 0x22a   : > { %v5669_v52 = vpop.f32.mrf.mxu1 }
 0x22b   : > { %v1783_v47 = vadd.f32 %v5669_v52, %v1700_v6 }
 0x22c   : > { %v1766_v53 = vpop.f32.mrf.mxu1 }
 0x22d   : > { %v1781_v3 = vadd.f32 %v1766_v53, %v1698_v11 }
 0x22e   : > { %v5670_v23 = vpop.f32.mrf.mxu1 }
 0x22f   : > { %v1784_v19 = vadd.f32 %v5670_v23, %v1701_v18 }
 0x230   : > { %v1769_v54 = vpop.f32.mrf.mxu1 }
 0x231   : > { %v1782_v26 = vadd.f32 %v1769_v54, %v1699_v12 }
 0x232   : > { %v5677_v28 = vpop.f32.mrf.mxu1 }
 0x233   : > { %v1866_v7 = vadd.f32 %v5677_v28, %v1783_v47 }
 0x234   : > { %v1849_v62 = vpop.f32.mrf.mxu1 }
 0x235   : > { %v1864_v20 = vadd.f32 %v1849_v62, %v1781_v3 }
 0x236   : > { %v5678_v2 = vpop.f32.mrf.mxu1 }
 0x237   : > { %v1867_v27 = vadd.f32 %v5678_v2, %v1784_v19 }
 0x238   : > { %v1852_v8 = vpop.f32.mrf.mxu1 }
 0x239   : > { %v1865_v42 = vadd.f32 %v1852_v8, %v1782_v26 }
 0x23a   : > { %v5685_v15 = vpop.f32.mrf.mxu1 }
 0x23b   : > { %v1963_v21 = vadd.f32 %v5685_v15, %v1866_v7  ;;  %v5939_v15 = vld [vmem:[%s7567_s5 + $0x58] sm:$0xff]  }
 0x23c   : > { %v1946_v13 = vpop.f32.mrf.mxu1 }
 0x23d   : > { %v1961_v29 = vadd.f32 %v1946_v13, %v1864_v20  ;;  %v2042_v16 = vadd.f32 %v5693_v14, %v1963_v21  ;;  %v5940_v21 = vld [vmem:[%s7567_s5 + $0x68] sm:$0xff]  }
 0x23e   : > { %v5686_v25 = vpop.f32.mrf.mxu1 }
 0x23f   : > { %v1964_v31 = vadd.f32 %v5686_v25, %v1867_v27  ;;  %v2040_v36 = vadd.f32 %v2025_v24, %v1961_v29 }
 0x240   : > { %v1949_v30 = vpop.f32.mrf.mxu1 }
 0x241   : > { %v1962_v34 = vadd.f32 %v1949_v30, %v1865_v42  ;;  %v2043_v40 = vadd.f32 %v5694_v32, %v1964_v31  ;;  %v5941_v31 = vld [vmem:[%s7567_s5 + $0x50] sm:$0xff]  }
 0x242   : > { %v5701_v33 = vpop.f32.mrf.mxu1 }
 0x243   : > { %v2125_v35 = vadd.f32 %v5701_v33, %v2042_v16  ;;  %v2041_v50 = vadd.f32 %v2028_v43, %v1962_v34  ;;  %v5942_v34 = vld [vmem:[%s7567_s5 + $0x60] sm:$0xff]   ;;  %v5949_v43 = vld [vmem:[%s7567_s5 + $0x90] sm:$0xff]  }
 0x244   : > { %v2108_v38 = vpop.f32.mrf.mxu1 }
 0x245   : > { %v2123_v39 = vadd.f32 %v2108_v38, %v2040_v36  ;;  %v2136_v48 = vadd.f32 %v5108_v37, %v2125_v35  ;;  %v5943_v35 = vld [vmem:[%s7567_s5 + $0x48] sm:$0xff]   ;;  %v5944_v36 = vld [vmem:[%s7567_s5 + $0xb8] sm:$0xff]   ;;  %v5946_v38 = vld [vmem:[%s7567_s5 + $0xb0] sm:$0xff]  }
 0x246   : > { %v5702_v44 = vpop.f32.mrf.mxu1 }
 0x247   : > { %v2126_v49 = vadd.f32 %v5702_v44, %v2043_v40  ;;  %v2134_v53 = vadd.f32 %v5108_v37, %v2123_v39  ;;  %v2140_v51 = vmax.f32 %v2136_v48, 0.0  ;;  %v5947_v39 = vld [vmem:[%s7567_s5 + $0x98] sm:$0xff]   ;;  %v5948_v40 = vld [vmem:[%s7567_s5 + $0xa8] sm:$0xff]   ;;  %v5950_v44 = vld [vmem:[%s7567_s5 + $0xa0] sm:$0xff]  }
 0x248   : > { %v2111_v52 = vpop.f32.mrf.mxu1  ;;  %v5951_v48 = vld [vmem:[%s7567_s5 + $0x88] sm:$0xff]  }
 0x249   : > { %v2137_v45 = vadd.f32 %v5108_v37, %v2126_v49  ;;  %v2124_v23 = vadd.f32 %v2111_v52, %v2041_v50  ;;  %v2138_v56 = vmax.f32 %v2134_v53, 0.0  ;;  %v5952_v49 = vld [vmem:[%s7567_s5 + $0xf8] sm:$0xff]   ;;  %v5953_v50 = vld [vmem:[%s7567_s5 + $0x80] sm:$0xff]   ;;  %v5954_v52 = vld [vmem:[%s7567_s5 + $0xf0] sm:$0xff]  }
 0x24a   : > { %v5955_v53 = vld [vmem:[%s7567_s5 + $0xd8] sm:$0xff]  }
 0x24b   : > { %v2141_v54 = vmax.f32 %v2137_v45, 0.0  ;;  %v2135_v55 = vadd.f32 %v5108_v37, %v2124_v23  ;;  %v5945_v37 = vld [vmem:[%s7567_s5 + $0x40] sm:$0xff]   ;;  %v5956_v45 = vld [vmem:[%s7567_s5 + $0xe8] sm:$0xff]   ;;  %v5957_v23 = vld [vmem:[%s7567_s5 + $0xd0] sm:$0xff]  }
 0x24d   : > { %v2143_v57 = vpack.c.bf16 %v2141_v54, %v2140_v51  ;;  %v2139_v28 = vmax.f32 %v2135_v55, 0.0  ;;  %v5958_v51 = vld [vmem:[%s7567_s5 + $0xe0] sm:$0xff]   ;;  %v5959_v54 = vld [vmem:[%s7567_s5 + $0xc8] sm:$0xff]  }
 0x24e   : > { %v5960_v55 = vld [vmem:[%s7567_s5 + $0xc0] sm:$0xff]  }
 0x24f   : > { %v2142_v59 = vpack.c.bf16 %v2139_v28, %v2138_v56  ;;  %v2395_v60 = vrot.slane %v2143_v57, 3  ;;  %v2314_v61 = vrot.slane %v2143_v57, 1  ;;  %v2566_v62 = vrot.slane %v2143_v57, 4  ;;  %v5961_v56 = vld [vmem:[%s7567_s5 + $0x118] sm:$0xff]   ;;  %v5963_v28 = vld [vmem:[%s7567_s5 + $0x108] sm:$0xff]  }
 0x250   : > { %v2479_v10 = vshrl.u32 %v2143_v57, 16  ;;  %v2482_v63 = vshll.u32 %v2143_v57, 16  ;;  %v2647_v7 = vrot.slane %v2143_v57, 6  ;;  %v2813_v27 = vrot.slane %v2143_v57, 7  ;;  %v5962_v57 = vld [vmem:[%s7567_s5 + $0x110] sm:$0xff]  }
 0x251   : > { %5724 = vmatmul.mubr.msk.bf16.vlgmr.msra.gmra.mxu1 %vm2191_vm1, %v2142_v59  ;;  %v2161_v0 = vshrl.u32 %v2142_v59, 16  ;;  %v2163_v1 = vshll.u32 %v2142_v59, 16  ;;  %v2394_v2 = vrot.slane %v2142_v59, 3  ;;  %v2313_v4 = vrot.slane %v2142_v59, 1 }
 0x252   : > { %5740 = vmatpush3.bf16.msra.mxu1 %v5936_v58  ;;  %5747 = vmatprep.mubr.msk.bf16.mxu1 %vm6276_vm0, %v6275_v41  ;;  %v2565_v22 = vrot.slane %v2142_v59, 4  ;;  %v2481_v6 = vrot.slane %v2479_v10, 3  ;;  %v2484_v8 = vrot.slane %v2482_v63, 4  ;;  %v2730_v9 = vrot.slane %v2479_v10, 6  ;;  %v5964_v58 = vld [vmem:[%s7567_s5 + $0x100] sm:$0xff]  }
 0x253   : > { %5741 = vmatprep.subr.bf16.mxu1 %v6275_v41  ;;  %v2165_v46 = vrot.slane %v2163_v1, 1  ;;  %v2396_v11 = vsel %vm924_vm2, %v2394_v2, %v2395_v60  ;;  %v2315_v47 = vsel %vm1969_vm8, %v2313_v4, %v2314_v61  ;;  %v2475_v14 = vrot.slane %v2161_v0, 3  ;;  %v5967_v60 = vld [vmem:[%s7569_s7 + $0xe4] ss:$16 sps:$4 sm:$0xff]   ;;  %v5968_v61 = vld [vmem:[%s7569_s7 + $0xe8] ss:$16 sps:$4 sm:$0xff]  }
 0x254   : > { %v6803_v17 = vsel %vm1447_vm9, %v2565_v22, %v2566_v62  ;;  %v2476_v18 = vrot.slane %v2163_v1, 4  ;;  %v2727_v3 = vrot.slane %v2161_v0, 6  ;;  %v2728_v12 = vrot.slane %v2163_v1, 7  ;;  %v5973_v62 = vld [vmem:[%s7569_s7 + $0xc4] ss:$16 sps:$4 sm:$0xff]  }
 0x255   : > { %v2166_v13 = vor.u32 %v2165_v46, %v2161_v0  ;;  %v2731_v19 = vrot.slane %v2482_v63, 7  ;;  %v2646_v20 = vrot.slane %v2142_v59, 6  ;;  %v2485_v25 = vor.u32 %v2484_v8, %v2481_v6  ;;  %v5976_v10 = vld [vmem:[%s7569_s7 + $0xcc] ss:$16 sps:$4 sm:$0xff]   ;;  %v5971_v63 = vld [vmem:[%s7569_s7 + $0xc0] ss:$16 sps:$4 sm:$0xff]  }
 0x256   : > { %5742 = vmatpush3.bf16.msra.mxu1 %v5938_v5  ;;  %v2477_v24 = vor.u32 %v2476_v18, %v2475_v14  ;;  %v2812_v26 = vrot.slane %v2142_v59, 7  ;;  %v2729_v29 = vor.u32 %v2728_v12, %v2727_v3  ;;  %v5965_v59 = vld [vmem:[%s7569_s7 + $0xe0] ss:$16 sps:$4 sm:$0xff]   ;;  %v5974_v0 = vld [vmem:[%s7569_s7 + $0xc8] ss:$16 sps:$4 sm:$0xff]   ;;  %v6277_v46 = vmov 0  }
 0x257   : > { %5712 = vmatmul.mubr.msk.bf16.vlgmr.msra.gmra.mxu0 %vm2191_vm1, %v2166_v13  ;;  %5743 = vmatprep.subr.bf16.mxu1 %v6275_v41  ;;  %v2732_v30 = vor.u32 %v2731_v19, %v2730_v9  ;;  %v6811_v42 = vsel %vm1791_vm13, %v2646_v20, %v2647_v7  ;;  %v5979_v1 = vld [vmem:[%s7569_s7 + $0xa4] ss:$16 sps:$4 sm:$0xff]   ;;  %v5982_v2 = vld [vmem:[%s7569_s7 + $0xac] ss:$16 sps:$4 sm:$0xff]   ;;  %v5977_v4 = vld [vmem:[%s7569_s7 + $0xa0] ss:$16 sps:$4 sm:$0xff]  }
 0x258   : > { %5728 = vmatpush3.bf16.msra.mxu0 %v5939_v15  ;;  %5735 = vmatprep.mubr.msk.bf16.mxu0 %vm6276_vm0, %v6275_v41  ;;  %v2486_v16 = vsel %vm1005_vm3, %v2477_v24, %v2485_v25  ;;  %v6820_v32 = vsel %vm1625_vm11, %v2812_v26, %v2813_v27  ;;  %v5980_v5 = vld [vmem:[%s7569_s7 + $0xa8] ss:$16 sps:$4 sm:$0xff]   ;;  %v5983_v22 = vld [vmem:[%s7569_s7 + $0x80] ss:$16 sps:$4 sm:$0xff]   ;;  %v5985_v6 = vld [vmem:[%s7569_s7 + $0x84] ss:$16 sps:$4 sm:$0xff]  }
 0x259   : > { %5729 = vmatprep.subr.bf16.mxu0 %v6275_v41  ;;  %v6824_v33 = vsel %vm1872_vm14, %v2729_v29, %v2732_v30  ;;  %v5986_v8 = vld [vmem:[%s7569_s7 + $0x88] ss:$16 sps:$4 sm:$0xff]   ;;  %v5988_v9 = vld [vmem:[%s7569_s7 + $0x8c] ss:$16 sps:$4 sm:$0xff]  }
 0x25a   : > { %5744 = vmatpush3.bf16.msra.mxu1 %v5940_v21 }
 0x25b   : > { %5745 = vmatprep.subr.bf16.mxu1 %v6275_v41 }
 0x25c   : > { %5730 = vmatpush3.bf16.msra.mxu0 %v5941_v31 }
 0x25d   : > { %5731 = vmatprep.subr.bf16.mxu0 %v6275_v41 }
 0x25e   : > { %5746 = vmatpush3.bf16.msra.mxu1 %v5942_v34 }
 0x25f   : > { %5763 = vmatprep.subr.bf16.mxu1 %v6275_v41 }
 0x260   : > { %5732 = vmatpush3.bf16.msra.mxu0 %v5943_v35 }
 0x261   : > { %5748 = vmatmul.mubr.msk.bf16.vlgmr.msra.gmra.mxu1 %vm2191_vm1, %v2396_v11  ;;  %5733 = vmatprep.subr.bf16.mxu0 %v6275_v41  ;;  %v5991_v11 = vld [vmem:[%s7569_s7 + $0x64] ss:$16 sps:$4 sm:$0xff]  }
 0x262   : > { %5764 = vmatpush3.bf16.msra.mxu1 %v5944_v36  ;;  %5771 = vmatprep.mubr.msk.bf16.mxu1 %vm6276_vm0, %v6275_v41 }
 0x263   : > { %5765 = vmatprep.subr.bf16.mxu1 %v6275_v41 }
 0x264   : > { %5734 = vmatpush3.bf16.msra.mxu0 %v5945_v37 }
 0x265   : > { %5751 = vmatprep.subr.bf16.mxu0 %v6275_v41 }
 0x266   : > { %5766 = vmatpush3.bf16.msra.mxu1 %v5946_v38 }
 0x267   : > { %5736 = vmatmul.mubr.msk.bf16.vlgmr.msra.gmra.mxu0 %vm2191_vm1, %v2315_v47  ;;  %5767 = vmatprep.subr.bf16.mxu1 %v6275_v41  ;;  %v5994_v47 = vld [vmem:[%s7569_s7 + $0x6c] ss:$16 sps:$4 sm:$0xff]  }
 0x268   : > { %5752 = vmatpush3.bf16.msra.mxu0 %v5947_v39  ;;  %5759 = vmatprep.mubr.msk.bf16.mxu0 %vm6276_vm0, %v6275_v41 }
 0x269   : > { %5753 = vmatprep.subr.bf16.mxu0 %v6275_v41 }
 0x26a   : > { %5768 = vmatpush3.bf16.msra.mxu1 %v5948_v40 }
 0x26b   : > { %5769 = vmatprep.subr.bf16.mxu1 %v6275_v41 }
 0x26c   : > { %5754 = vmatpush3.bf16.msra.mxu0 %v5949_v43 }
 0x26d   : > { %5755 = vmatprep.subr.bf16.mxu0 %v6275_v41 }
 0x26e   : > { %5770 = vmatpush3.bf16.msra.mxu1 %v5950_v44 }
 0x26f   : > { %5787 = vmatprep.subr.bf16.mxu1 %v6275_v41 }
 0x270   : > { %5756 = vmatpush3.bf16.msra.mxu0 %v5951_v48 }
 0x271   : > { %5772 = vmatmul.mubr.msk.bf16.vlgmr.msra.gmra.mxu1 %vm2191_vm1, %v6803_v17  ;;  %5757 = vmatprep.subr.bf16.mxu0 %v6275_v41 }
 0x272   : > { %5788 = vmatpush3.bf16.msra.mxu1 %v5952_v49  ;;  %5795 = vmatprep.mubr.msk.bf16.mxu1 %vm6276_vm0, %v6275_v41 }
 0x273   : > { %5789 = vmatprep.subr.bf16.mxu1 %v6275_v41 }
 0x274   : > { %5758 = vmatpush3.bf16.msra.mxu0 %v5953_v50 }
 0x275   : > { %5775 = vmatprep.subr.bf16.mxu0 %v6275_v41 }
 0x276   : > { %5790 = vmatpush3.bf16.msra.mxu1 %v5954_v52 }
 0x277   : > { %5760 = vmatmul.mubr.msk.bf16.vlgmr.msra.gmra.mxu0 %vm2191_vm1, %v2486_v16  ;;  %5791 = vmatprep.subr.bf16.mxu1 %v6275_v41 }
 0x278   : > { %5776 = vmatpush3.bf16.msra.mxu0 %v5955_v53  ;;  %5783 = vmatprep.mubr.msk.bf16.mxu0 %vm6276_vm0, %v6275_v41 }
 0x279   : > { %5777 = vmatprep.subr.bf16.mxu0 %v6275_v41 }
 0x27a   : > { %5792 = vmatpush3.bf16.msra.mxu1 %v5956_v45 }
 0x27b   : > { %5793 = vmatprep.subr.bf16.mxu1 %v6275_v41 }
 0x27c   : > { %5778 = vmatpush3.bf16.msra.mxu0 %v5957_v23 }
 0x27d   : > { %5779 = vmatprep.subr.bf16.mxu0 %v6275_v41 }
 0x27e   : > { %5794 = vmatpush3.bf16.msra.mxu1 %v5958_v51 }
 0x27f   : > { %3023 = vmatprep.subr.bf16.mxu1 %v5967_v60 }
 0x280   : > { %5780 = vmatpush3.bf16.msra.mxu0 %v5959_v54 }
 0x281   : > { %5796 = vmatmul.mubr.msk.bf16.vlgmr.msra.gmra.mxu1 %vm2191_vm1, %v6824_v33  ;;  %5781 = vmatprep.subr.bf16.mxu0 %v6275_v41 }
 0x282   : > { %3024 = vmatpush1.bf16.msra.mxu1 %v5965_v59  ;;  %3047 = vmatprep.mubr.bf16.mxu1 %v6277_v46 }
 0x283   : > { %3025 = vmatprep.subr.bf16.mxu1 %v5973_v62 }
 0x284   : > { %5782 = vmatpush3.bf16.msra.mxu0 %v5960_v55 }
 0x285   : > { %5799 = vmatprep.subr.bf16.mxu0 %v6275_v41 }
 0x286   : > { %3026 = vmatpush1.bf16.msra.mxu1 %v5971_v63 }
 0x287   : > { %5784 = vmatmul.mubr.msk.bf16.vlgmr.msra.gmra.mxu0 %vm2191_vm1, %v6811_v42  ;;  %3027 = vmatprep.subr.bf16.mxu1 %v5979_v1 }
 0x288   : > { %5800 = vmatpush3.bf16.msra.mxu0 %v5961_v56  ;;  %5807 = vmatprep.mubr.msk.bf16.mxu0 %vm6276_vm0, %v6275_v41 }
 0x289   : > { %5801 = vmatprep.subr.bf16.mxu0 %v6275_v41 }
 0x28a   : > { %3028 = vmatpush1.bf16.msra.mxu1 %v5977_v4 }
 0x28b   : > { %3029 = vmatprep.subr.bf16.mxu1 %v5985_v6  ;;  %v5989_v6 = vld [vmem:[%s7569_s7 + $0x60] ss:$16 sps:$4 sm:$0xff]  }
 0x28c   : > { %5802 = vmatpush3.bf16.msra.mxu0 %v5962_v57 }
 0x28d   : > { %5803 = vmatprep.subr.bf16.mxu0 %v6275_v41 }
 0x28e   : > { %3030 = vmatpush1.bf16.msra.mxu1 %v5983_v22 }
 0x28f   : > { %3187 = vmatprep.subr.bf16.mxu1 %v5991_v11  ;;  %v5997_v11 = vld [vmem:[%s7569_s7 + $0x44] ss:$16 sps:$4 sm:$0xff]  }
 0x290   : > { %5804 = vmatpush3.bf16.msra.mxu0 %v5963_v28 }
 0x291   : > { %5805 = vmatprep.subr.bf16.mxu0 %v6275_v41  ;;  %v5970_v41 = vld [vmem:[%s7569_s7 + $0xec] ss:$16 sps:$4 sm:$0xff]  }
 0x294   : > { %5806 = vmatpush3.bf16.msra.mxu0 %v5964_v58 }
 0x295   : > { %3064 = vmatprep.subr.bf16.mxu0 %v5970_v41 }
 0x297   : > { %5808 = vmatmul.mubr.msk.bf16.vlgmr.msra.gmra.mxu0 %vm2191_vm1, %v6820_v32 }
 0x298   : > { %3065 = vmatpush1.bf16.msra.mxu0 %v5968_v61  ;;  %3088 = vmatprep.mubr.bf16.mxu0 %v6277_v46  ;;  %v5154_v61 = vld [vmem:[%s7568_s6] ss:$0 sm:$0xff] }
 0x299   : > { %3066 = vmatprep.subr.bf16.mxu0 %v5976_v10 }
 0x29c   : > { %3067 = vmatpush1.bf16.msra.mxu0 %v5974_v0 }
 0x29d   : > { %3068 = vmatprep.subr.bf16.mxu0 %v5982_v2 }
 0x2a0   : > { %3069 = vmatpush1.bf16.msra.mxu0 %v5980_v5 }
 0x2a1   : > { %3070 = vmatprep.subr.bf16.mxu0 %v5988_v9 }
 0x2a4   : > { %3071 = vmatpush1.bf16.msra.mxu0 %v5986_v8  ;;  %v5992_v8 = vld [vmem:[%s7569_s7 + $0x68] ss:$16 sps:$4 sm:$0xff]  }
 0x2a5   : > { %3228 = vmatprep.subr.bf16.mxu0 %v5994_v47  ;;  %v6000_v47 = vld [vmem:[%s7569_s7 + $0x4c] ss:$16 sps:$4 sm:$0xff]  }
 0x311   : > { %v2296_v14 = vpop.f32.mrf.mxu1 }
 0x313   : > { %v5725_v15 = vpop.f32.mrf.mxu1 }
 0x314   : > { %v5998_v15 = vld [vmem:[%s7569_s7 + $0x48] ss:$16 sps:$4 sm:$0xff]  }
 0x315   : > { %v2299_v17 = vpop.f32.mrf.mxu1 }
 0x317   : > { %v2229_v18 = vpop.f32.mrf.mxu0  ;;  %v5726_v3 = vpop.f32.mrf.mxu1 }
 0x318   : > { %v2297_v38 = vadd.f32 %v2296_v14, %v2229_v18  ;;  %v5995_v14 = vld [vmem:[%s7569_s7 + $0x40] ss:$16 sps:$4 sm:$0xff]   ;;  %v6006_v18 = vld [vmem:[%s7569_s7 + $0x2c] ss:$16 sps:$4 sm:$0xff]  }
 0x319   : > { %v5713_v7 = vpop.f32.mrf.mxu0  ;;  %v6001_v3 = vld [vmem:[%s7569_s7 + $0x20] ss:$16 sps:$4 sm:$0xff]  }
 0x31a   : > { %v6004_v7 = vld [vmem:[%s7569_s7 + $0x28] ss:$16 sps:$4 sm:$0xff]  }
 0x31b   : > { %v2232_v13 = vpop.f32.mrf.mxu0 }
 0x31c   : > { %v2300_v48 = vadd.f32 %v2299_v17, %v2232_v13  ;;  %v6003_v17 = vld [vmem:[%s7569_s7 + $0x24] ss:$16 sps:$4 sm:$0xff]  }
 0x31d   : > { %v5714_v12 = vpop.f32.mrf.mxu0  ;;  %v6009_v13 = vld [vmem:[%s7569_s7 + $0x4] ss:$16 sps:$4 sm:$0xff]  }
 0x31e   : > { %v6012_v12 = vld [vmem:[%s7569_s7 + $0xc] ss:$16 sps:$4 sm:$0xff]  }
 0x321   : > { %v2458_v19 = vpop.f32.mrf.mxu1 }
 0x323   : > { %v5749_v20 = vpop.f32.mrf.mxu1 }
 0x324   : > { %v6010_v20 = vld [vmem:[%s7569_s7 + $0x8] ss:$16 sps:$4 sm:$0xff]  }
 0x325   : > { %v2461_v21 = vpop.f32.mrf.mxu1 }
 0x327   : > { %v2377_v24 = vpop.f32.mrf.mxu0  ;;  %v5750_v25 = vpop.f32.mrf.mxu1 }
 0x328   : > { %v2384_v40 = vadd.f32 %v2377_v24, %v2297_v38  ;;  %v6018_v24 = vld [vmem:[%s7569_s7 + $0x16c] ss:$16 sps:$4 sm:$0xff]   ;;  %v6013_v25 = vld [vmem:[%s7569_s7 + $0x160] ss:$16 sps:$4 sm:$0xff]   ;;  %v6039_v38 = vld [vmem:[%s7569_s7 + $0x1e4] ss:$16 sps:$4 sm:$0xff]  }
 0x329   : > { %v5737_v26 = vpop.f32.mrf.mxu0 }
 0x32a   : > { %v2465_v52 = vadd.f32 %v2458_v19, %v2384_v40  ;;  %v6007_v19 = vld [vmem:[%s7569_s7] ss:$16 sps:$4 sm:$0xff]   ;;  %v6016_v26 = vld [vmem:[%s7569_s7 + $0x168] ss:$16 sps:$4 sm:$0xff]  }
 0x32b   : > { %v2380_v27 = vpop.f32.mrf.mxu0  ;;  %v6037_v40 = vld [vmem:[%s7569_s7 + $0x1e0] ss:$16 sps:$4 sm:$0xff]  }
 0x32c   : > { %v2385_v50 = vadd.f32 %v2380_v27, %v2300_v48  ;;  %v6021_v27 = vld [vmem:[%s7569_s7 + $0x144] ss:$16 sps:$4 sm:$0xff]  }
 0x32d   : > { %v5738_v29 = vpop.f32.mrf.mxu0  ;;  %v6045_v48 = vld [vmem:[%s7569_s7 + $0x1c4] ss:$16 sps:$4 sm:$0xff]  }
 0x32e   : > { %v2466_v51 = vadd.f32 %v2461_v21, %v2385_v50  ;;  %v6015_v21 = vld [vmem:[%s7569_s7 + $0x164] ss:$16 sps:$4 sm:$0xff]   ;;  %v6024_v29 = vld [vmem:[%s7569_s7 + $0x14c] ss:$16 sps:$4 sm:$0xff]   ;;  %v6043_v50 = vld [vmem:[%s7569_s7 + $0x1c0] ss:$16 sps:$4 sm:$0xff]  }
 0x331   : > { %v2629_v30 = vpop.f32.mrf.mxu1 }
 0x333   : > { %v5773_v42 = vpop.f32.mrf.mxu1 }
 0x334   : > { %v6022_v42 = vld [vmem:[%s7569_s7 + $0x148] ss:$16 sps:$4 sm:$0xff]  }
 0x335   : > { %v2632_v31 = vpop.f32.mrf.mxu1 }
 0x337   : > { %v2548_v16 = vpop.f32.mrf.mxu0  ;;  %v5774_v32 = vpop.f32.mrf.mxu1 }
 0x338   : > { %v2555_v45 = vadd.f32 %v2548_v16, %v2465_v52  ;;  %v6030_v16 = vld [vmem:[%s7569_s7 + $0x12c] ss:$16 sps:$4 sm:$0xff]   ;;  %v6025_v32 = vld [vmem:[%s7569_s7 + $0x120] ss:$16 sps:$4 sm:$0xff]   ;;  %v6046_v52 = vld [vmem:[%s7569_s7 + $0x1c8] ss:$16 sps:$4 sm:$0xff]  }
 0x339   : > { %v5761_v33 = vpop.f32.mrf.mxu0 }
 0x33a   : > { %v2636_v55 = vadd.f32 %v2629_v30, %v2555_v45  ;;  %v6019_v30 = vld [vmem:[%s7569_s7 + $0x140] ss:$16 sps:$4 sm:$0xff]   ;;  %v6028_v33 = vld [vmem:[%s7569_s7 + $0x128] ss:$16 sps:$4 sm:$0xff]   ;;  %v6054_v45 = vld [vmem:[%s7569_s7 + $0x1ac] ss:$16 sps:$4 sm:$0xff]  }
 0x33b   : > { %v2551_v34 = vpop.f32.mrf.mxu0 }
 0x33c   : > { %v2556_v54 = vadd.f32 %v2551_v34, %v2466_v51  ;;  %v6033_v34 = vld [vmem:[%s7569_s7 + $0x104] ss:$16 sps:$4 sm:$0xff]   ;;  %v6052_v51 = vld [vmem:[%s7569_s7 + $0x1a8] ss:$16 sps:$4 sm:$0xff]  }
 0x33d   : > { %v5762_v35 = vpop.f32.mrf.mxu0 }
 0x33e   : > { %v2637_v57 = vadd.f32 %v2632_v31, %v2556_v54  ;;  %v6027_v31 = vld [vmem:[%s7569_s7 + $0x124] ss:$16 sps:$4 sm:$0xff]   ;;  %v6036_v35 = vld [vmem:[%s7569_s7 + $0x10c] ss:$16 sps:$4 sm:$0xff]  }
 0x33f   : > { %v6057_v54 = vld [vmem:[%s7569_s7 + $0x184] ss:$16 sps:$4 sm:$0xff]  }
 0x341   : > { %v2795_v36 = vpop.f32.mrf.mxu1 }
 0x343   : > { %v5797_v37 = vpop.f32.mrf.mxu1 }
 0x344   : > { %v6034_v37 = vld [vmem:[%s7569_s7 + $0x108] ss:$16 sps:$4 sm:$0xff]  }
 0x345   : > { %v2798_v39 = vpop.f32.mrf.mxu1 }
 0x347   : > { %v2710_v43 = vpop.f32.mrf.mxu0  ;;  %v5798_v44 = vpop.f32.mrf.mxu1 }
 0x348   : > { %v2717_v56 = vadd.f32 %v2710_v43, %v2636_v55  ;;  %v6040_v43 = vld [vmem:[%s7569_s7 + $0x1e8] ss:$16 sps:$4 sm:$0xff]   ;;  %v6060_v55 = vld [vmem:[%s7569_s7 + $0x18c] ss:$16 sps:$4 sm:$0xff]  }
 0x349   : > { %v5785_v49 = vpop.f32.mrf.mxu0 }
 0x34a   : > { %v2802_v58 = vadd.f32 %v2795_v36, %v2717_v56  ;;  %v6031_v36 = vld [vmem:[%s7569_s7 + $0x100] ss:$16 sps:$4 sm:$0xff]   ;;  %v6048_v49 = vld [vmem:[%s7569_s7 + $0x1cc] ss:$16 sps:$4 sm:$0xff]  }
 0x34b   : > { %v2713_v53 = vpop.f32.mrf.mxu0  ;;  %v6055_v56 = vld [vmem:[%s7569_s7 + $0x180] ss:$16 sps:$4 sm:$0xff]  }
 0x34c   : > { %v2718_v28 = vadd.f32 %v2713_v53, %v2637_v57  ;;  %v6051_v53 = vld [vmem:[%s7569_s7 + $0x1a4] ss:$16 sps:$4 sm:$0xff]   ;;  %v6058_v57 = vld [vmem:[%s7569_s7 + $0x188] ss:$16 sps:$4 sm:$0xff]  }
 0x34d   : > { %v5786_v23 = vpop.f32.mrf.mxu0 }
 0x34e   : > { %v2803_v62 = vadd.f32 %v2798_v39, %v2718_v28  ;;  %v6042_v39 = vld [vmem:[%s7569_s7 + $0x1ec] ss:$16 sps:$4 sm:$0xff]   ;;  %v6049_v23 = vld [vmem:[%s7569_s7 + $0x1a0] ss:$16 sps:$4 sm:$0xff]   ;;  %v6063_v28 = vld [vmem:[%s7569_s7 + $0x264] ss:$16 sps:$4 sm:$0xff]  }
 0x357   : > { %v2876_v59 = vpop.f32.mrf.mxu0 }
 0x358   : > { %v2883_v60 = vadd.f32 %v2876_v59, %v2802_v58  ;;  %v6066_v58 = vld [vmem:[%s7569_s7 + $0x26c] ss:$16 sps:$4 sm:$0xff]   ;;  %v6061_v59 = vld [vmem:[%s7569_s7 + $0x260] ss:$16 sps:$4 sm:$0xff]  }
 0x359   : > { %v5809_v41 = vpop.f32.mrf.mxu0 }
 0x35a   : > { %v2892_v63 = vadd.f32 %v5154_v61, %v2883_v60  ;;  %v6064_v60 = vld [vmem:[%s7569_s7 + $0x268] ss:$16 sps:$4 sm:$0xff]   ;;  %v6069_v41 = vld [vmem:[%s7569_s7 + $0x244] ss:$16 sps:$4 sm:$0xff]  }
 0x35b   : > { %v2879_v10 = vpop.f32.mrf.mxu0 }
 0x35c   : > { %v2884_v0 = vadd.f32 %v2879_v10, %v2803_v62  ;;  %v2894_v4 = vmax.f32 %v2892_v63, 0.0  ;;  %v6072_v62 = vld [vmem:[%s7569_s7 + $0x24c] ss:$16 sps:$4 sm:$0xff]   ;;  %v6067_v10 = vld [vmem:[%s7569_s7 + $0x240] ss:$16 sps:$4 sm:$0xff]  }
 0x35d   : > { %v5810_v1 = vpop.f32.mrf.mxu0  ;;  %v6070_v63 = vld [vmem:[%s7569_s7 + $0x248] ss:$16 sps:$4 sm:$0xff]  }
 0x35e   : > { %v2893_v2 = vadd.f32 %v5154_v61, %v2884_v0  ;;  %v6075_v0 = vld [vmem:[%s7569_s7 + $0x224] ss:$16 sps:$4 sm:$0xff]   ;;  %v6078_v1 = vld [vmem:[%s7569_s7 + $0x22c] ss:$16 sps:$4 sm:$0xff]  }
 0x360   : > { %v2895_v5 = vmax.f32 %v2893_v2, 0.0  ;;  %v6073_v2 = vld [vmem:[%s7569_s7 + $0x220] ss:$16 sps:$4 sm:$0xff]  }
 0x362   : > { %v6998_v22 = vpack.c.bf16 %v2895_v5, %v2894_v4  ;;  %v6076_v4 = vld [vmem:[%s7569_s7 + $0x228] ss:$16 sps:$4 sm:$0xff]   ;;  %v6081_v5 = vld [vmem:[%s7569_s7 + $0x204] ss:$16 sps:$4 sm:$0xff]  }
 0x364   : > { %v7007_v9 = vshrl.u32 %v6998_v22, 16  ;;  %v3278_v44 = vrot.slane %v6998_v22, 1  ;;  %v3464_v61 = vrot.slane %v6998_v22, 3 }
 0x366   : > { %5171 = vmatmul.mubr.msk.bf16.vlgmr.msra.gmra.mxu1 %vm2191_vm1, %v7007_v9  ;;  %5172 = vmatmul.mubr.msk.bf16.vlgmr.msra.gmra.mxu0 %vm2191_vm1, %v7007_v9 }
 0x367   : > { %3188 = vmatpush1.bf16.msra.mxu1 %v5989_v6  ;;  %3229 = vmatpush1.bf16.msra.mxu0 %v5992_v8  ;;  %v6084_v6 = vld [vmem:[%s7569_s7 + $0x20c] ss:$16 sps:$4 sm:$0xff]   ;;  %v6079_v8 = vld [vmem:[%s7569_s7 + $0x200] ss:$16 sps:$4 sm:$0xff]  }
 0x368   : > { %3189 = vmatprep.subr.bf16.mxu1 %v5997_v11  ;;  %3230 = vmatprep.subr.bf16.mxu0 %v6000_v47  ;;  %v6082_v11 = vld [vmem:[%s7569_s7 + $0x208] ss:$16 sps:$4 sm:$0xff]   ;;  %v6087_v47 = vld [vmem:[%s7569_s7 + $0x2e4] ss:$16 sps:$4 sm:$0xff]  }
 0x369   : > { %3211 = vmatprep.mubr.bf16.mxu1 %v6277_v46  ;;  %3252 = vmatprep.mubr.bf16.mxu0 %v6277_v46 }
 0x36b   : > { %3190 = vmatpush1.bf16.msra.mxu1 %v5995_v14  ;;  %3231 = vmatpush1.bf16.msra.mxu0 %v5998_v15  ;;  %v6090_v14 = vld [vmem:[%s7569_s7 + $0x2ec] ss:$16 sps:$4 sm:$0xff]   ;;  %v6085_v15 = vld [vmem:[%s7569_s7 + $0x2e0] ss:$16 sps:$4 sm:$0xff]  }
 0x36c   : > { %3191 = vmatprep.subr.bf16.mxu1 %v6003_v17  ;;  %3232 = vmatprep.subr.bf16.mxu0 %v6006_v18  ;;  %v6088_v17 = vld [vmem:[%s7569_s7 + $0x2e8] ss:$16 sps:$4 sm:$0xff]   ;;  %v3650_v18 = vrot.slane %v7007_v9, 3 }
 0x36f   : > { %3192 = vmatpush1.bf16.msra.mxu1 %v6001_v3  ;;  %3233 = vmatpush1.bf16.msra.mxu0 %v6004_v7  ;;  %v6093_v3 = vld [vmem:[%s7569_s7 + $0x2c4] ss:$16 sps:$4 sm:$0xff]   ;;  %v6096_v7 = vld [vmem:[%s7569_s7 + $0x2cc] ss:$16 sps:$4 sm:$0xff]  }
 0x370   : > { %3193 = vmatprep.subr.bf16.mxu1 %v6009_v13  ;;  %3234 = vmatprep.subr.bf16.mxu0 %v6012_v12  ;;  %v6091_v13 = vld [vmem:[%s7569_s7 + $0x2c0] ss:$16 sps:$4 sm:$0xff]   ;;  %v6094_v12 = vld [vmem:[%s7569_s7 + $0x2c8] ss:$16 sps:$4 sm:$0xff]  }
 0x373   : > { %3194 = vmatpush1.bf16.msra.mxu1 %v6007_v19  ;;  %3235 = vmatpush1.bf16.msra.mxu0 %v6010_v20  ;;  %v6099_v19 = vld [vmem:[%s7569_s7 + $0x2a4] ss:$16 sps:$4 sm:$0xff]   ;;  %v6102_v20 = vld [vmem:[%s7569_s7 + $0x2ac] ss:$16 sps:$4 sm:$0xff]  }
 0x374   : > { %3370 = vmatprep.subr.bf16.mxu1 %v6015_v21  ;;  %3411 = vmatprep.subr.bf16.mxu0 %v6018_v24  ;;  %v6097_v21 = vld [vmem:[%s7569_s7 + $0x2a0] ss:$16 sps:$4 sm:$0xff]   ;;  %v6100_v24 = vld [vmem:[%s7569_s7 + $0x2a8] ss:$16 sps:$4 sm:$0xff]  }
 0x376   : > { %5189 = vmatmul.mubr.msk.bf16.vlgmr.msra.gmra.mxu1 %vm2191_vm1, %v6998_v22  ;;  %5190 = vmatmul.mubr.msk.bf16.vlgmr.msra.gmra.mxu0 %vm2191_vm1, %v6998_v22 }
 0x377   : > { %3371 = vmatpush1.bf16.msra.mxu1 %v6013_v25  ;;  %3412 = vmatpush1.bf16.msra.mxu0 %v6016_v26  ;;  %v6105_v25 = vld [vmem:[%s7569_s7 + $0x284] ss:$16 sps:$4 sm:$0xff]   ;;  %v6108_v26 = vld [vmem:[%s7569_s7 + $0x28c] ss:$16 sps:$4 sm:$0xff]  }
 0x378   : > { %3372 = vmatprep.subr.bf16.mxu1 %v6021_v27  ;;  %3413 = vmatprep.subr.bf16.mxu0 %v6024_v29  ;;  %v6103_v27 = vld [vmem:[%s7569_s7 + $0x280] ss:$16 sps:$4 sm:$0xff]   ;;  %v6106_v29 = vld [vmem:[%s7569_s7 + $0x288] ss:$16 sps:$4 sm:$0xff]  }
 0x379   : > { %3394 = vmatprep.mubr.bf16.mxu1 %v6277_v46  ;;  %3435 = vmatprep.mubr.bf16.mxu0 %v6277_v46 }
 0x37b   : > { %3373 = vmatpush1.bf16.msra.mxu1 %v6019_v30  ;;  %3414 = vmatpush1.bf16.msra.mxu0 %v6022_v42  ;;  %v6111_v30 = vld [vmem:[%s7569_s7 + $0x364] ss:$16 sps:$4 sm:$0xff]   ;;  %v6114_v42 = vld [vmem:[%s7569_s7 + $0x36c] ss:$16 sps:$4 sm:$0xff]  }
 0x37c   : > { %3374 = vmatprep.subr.bf16.mxu1 %v6027_v31  ;;  %3415 = vmatprep.subr.bf16.mxu0 %v6030_v16  ;;  %v6109_v31 = vld [vmem:[%s7569_s7 + $0x360] ss:$16 sps:$4 sm:$0xff]   ;;  %v6112_v16 = vld [vmem:[%s7569_s7 + $0x368] ss:$16 sps:$4 sm:$0xff]  }
 0x37f   : > { %3375 = vmatpush1.bf16.msra.mxu1 %v6025_v32  ;;  %3416 = vmatpush1.bf16.msra.mxu0 %v6028_v33  ;;  %v3836_v32 = vrot.slane %v6998_v22, 4  ;;  %v6117_v33 = vld [vmem:[%s7569_s7 + $0x344] ss:$16 sps:$4 sm:$0xff]  }
 0x380   : > { %3376 = vmatprep.subr.bf16.mxu1 %v6033_v34  ;;  %3417 = vmatprep.subr.bf16.mxu0 %v6036_v35  ;;  %v6120_v34 = vld [vmem:[%s7569_s7 + $0x34c] ss:$16 sps:$4 sm:$0xff]   ;;  %v6115_v35 = vld [vmem:[%s7569_s7 + $0x340] ss:$16 sps:$4 sm:$0xff]  }
 0x383   : > { %3377 = vmatpush1.bf16.msra.mxu1 %v6031_v36  ;;  %3418 = vmatpush1.bf16.msra.mxu0 %v6034_v37  ;;  %v6118_v36 = vld [vmem:[%s7569_s7 + $0x348] ss:$16 sps:$4 sm:$0xff]   ;;  %v6123_v37 = vld [vmem:[%s7569_s7 + $0x324] ss:$16 sps:$4 sm:$0xff]  }
 0x384   : > { %3556 = vmatprep.subr.bf16.mxu1 %v6039_v38  ;;  %3597 = vmatprep.subr.bf16.mxu0 %v6042_v39  ;;  %v6126_v38 = vld [vmem:[%s7569_s7 + $0x32c] ss:$16 sps:$4 sm:$0xff]   ;;  %v6121_v39 = vld [vmem:[%s7569_s7 + $0x320] ss:$16 sps:$4 sm:$0xff]  }
 0x386   : > { %5207 = vmatmul.mubr.msk.bf16.vlgmr.msra.gmra.mxu1 %vm2191_vm1, %v3278_v44  ;;  %5208 = vmatmul.mubr.msk.bf16.vlgmr.msra.gmra.mxu0 %vm2191_vm1, %v3278_v44  ;;  %v6132_v44 = vld [vmem:[%s7569_s7 + $0x30c] ss:$16 sps:$4 sm:$0xff]  }
 0x387   : > { %3557 = vmatpush1.bf16.msra.mxu1 %v6037_v40  ;;  %3598 = vmatpush1.bf16.msra.mxu0 %v6040_v43  ;;  %v6124_v40 = vld [vmem:[%s7569_s7 + $0x328] ss:$16 sps:$4 sm:$0xff]   ;;  %v6129_v43 = vld [vmem:[%s7569_s7 + $0x304] ss:$16 sps:$4 sm:$0xff]  }
 0x388   : > { %3558 = vmatprep.subr.bf16.mxu1 %v6045_v48  ;;  %3599 = vmatprep.subr.bf16.mxu0 %v6048_v49  ;;  %v6127_v48 = vld [vmem:[%s7569_s7 + $0x300] ss:$16 sps:$4 sm:$0xff]   ;;  %v6130_v49 = vld [vmem:[%s7569_s7 + $0x308] ss:$16 sps:$4 sm:$0xff]  }
 0x389   : > { %3580 = vmatprep.mubr.bf16.mxu1 %v6277_v46  ;;  %3621 = vmatprep.mubr.bf16.mxu0 %v6277_v46 }
 0x38b   : > { %3559 = vmatpush1.bf16.msra.mxu1 %v6043_v50  ;;  %3600 = vmatpush1.bf16.msra.mxu0 %v6046_v52  ;;  %v6135_v50 = vld [vmem:[%s7569_s7 + $0x3e4] ss:$16 sps:$4 sm:$0xff]   ;;  %v6138_v52 = vld [vmem:[%s7569_s7 + $0x3ec] ss:$16 sps:$4 sm:$0xff]  }
 0x38c   : > { %3560 = vmatprep.subr.bf16.mxu1 %v6051_v53  ;;  %3601 = vmatprep.subr.bf16.mxu0 %v6054_v45  ;;  %v6133_v53 = vld [vmem:[%s7569_s7 + $0x3e0] ss:$16 sps:$4 sm:$0xff]   ;;  %v6136_v45 = vld [vmem:[%s7569_s7 + $0x3e8] ss:$16 sps:$4 sm:$0xff]  }
 0x38f   : > { %3561 = vmatpush1.bf16.msra.mxu1 %v6049_v23  ;;  %3602 = vmatpush1.bf16.msra.mxu0 %v6052_v51  ;;  %v4022_v23 = vrot.slane %v6998_v22, 6  ;;  %v6141_v51 = vld [vmem:[%s7569_s7 + $0x3c4] ss:$16 sps:$4 sm:$0xff]  }
 0x390   : > { %3562 = vmatprep.subr.bf16.mxu1 %v6057_v54  ;;  %3603 = vmatprep.subr.bf16.mxu0 %v6060_v55  ;;  %v6144_v54 = vld [vmem:[%s7569_s7 + $0x3cc] ss:$16 sps:$4 sm:$0xff]   ;;  %v6139_v55 = vld [vmem:[%s7569_s7 + $0x3c0] ss:$16 sps:$4 sm:$0xff]  }
 0x393   : > { %3563 = vmatpush1.bf16.msra.mxu1 %v6055_v56  ;;  %3604 = vmatpush1.bf16.msra.mxu0 %v6058_v57  ;;  %v6142_v56 = vld [vmem:[%s7569_s7 + $0x3c8] ss:$16 sps:$4 sm:$0xff]   ;;  %v6147_v57 = vld [vmem:[%s7569_s7 + $0x3a4] ss:$16 sps:$4 sm:$0xff]  }
 0x394   : > { %3742 = vmatprep.subr.bf16.mxu1 %v6063_v28  ;;  %3783 = vmatprep.subr.bf16.mxu0 %v6066_v58  ;;  %v6150_v28 = vld [vmem:[%s7569_s7 + $0x3ac] ss:$16 sps:$4 sm:$0xff]   ;;  %v6145_v58 = vld [vmem:[%s7569_s7 + $0x3a0] ss:$16 sps:$4 sm:$0xff]  }
 0x396   : > { %5225 = vmatmul.mubr.msk.bf16.vlgmr.msra.gmra.mxu1 %vm2191_vm1, %v3464_v61  ;;  %5226 = vmatmul.mubr.msk.bf16.vlgmr.msra.gmra.mxu0 %vm2191_vm1, %v3464_v61  ;;  %v6156_v61 = vld [vmem:[%s7569_s7 + $0x38c] ss:$16 sps:$4 sm:$0xff]  }
 0x397   : > { %3743 = vmatpush1.bf16.msra.mxu1 %v6061_v59  ;;  %3784 = vmatpush1.bf16.msra.mxu0 %v6064_v60  ;;  %v6148_v59 = vld [vmem:[%s7569_s7 + $0x3a8] ss:$16 sps:$4 sm:$0xff]   ;;  %v6153_v60 = vld [vmem:[%s7569_s7 + $0x384] ss:$16 sps:$4 sm:$0xff]  }
 0x398   : > { %3744 = vmatprep.subr.bf16.mxu1 %v6069_v41  ;;  %3785 = vmatprep.subr.bf16.mxu0 %v6072_v62  ;;  %v6151_v41 = vld [vmem:[%s7569_s7 + $0x380] ss:$16 sps:$4 sm:$0xff]   ;;  %v6154_v62 = vld [vmem:[%s7569_s7 + $0x388] ss:$16 sps:$4 sm:$0xff]  }
 0x399   : > { %3766 = vmatprep.mubr.bf16.mxu1 %v6277_v46  ;;  %3807 = vmatprep.mubr.bf16.mxu0 %v6277_v46 }
 0x39b   : > { %3745 = vmatpush1.bf16.msra.mxu1 %v6067_v10  ;;  %3786 = vmatpush1.bf16.msra.mxu0 %v6070_v63  ;;  %v6159_v10 = vld [vmem:[%s7569_s7 + $0x464] ss:$16 sps:$4 sm:$0xff]   ;;  %v6162_v63 = vld [vmem:[%s7569_s7 + $0x46c] ss:$16 sps:$4 sm:$0xff]  }
 0x39c   : > { %3746 = vmatprep.subr.bf16.mxu1 %v6075_v0  ;;  %3787 = vmatprep.subr.bf16.mxu0 %v6078_v1  ;;  %v6157_v0 = vld [vmem:[%s7569_s7 + $0x460] ss:$16 sps:$4 sm:$0xff]   ;;  %v6160_v1 = vld [vmem:[%s7569_s7 + $0x468] ss:$16 sps:$4 sm:$0xff]  }
 0x39f   : > { %3747 = vmatpush1.bf16.msra.mxu1 %v6073_v2  ;;  %3788 = vmatpush1.bf16.msra.mxu0 %v6076_v4  ;;  %v4208_v2 = vrot.slane %v7007_v9, 6  ;;  %v6165_v4 = vld [vmem:[%s7569_s7 + $0x444] ss:$16 sps:$4 sm:$0xff]   ;;  %v6163_v9 = vld [vmem:[%s7569_s7 + $0x440] ss:$16 sps:$4 sm:$0xff]  }
 0x3a0   : > { %3748 = vmatprep.subr.bf16.mxu1 %v6081_v5  ;;  %3789 = vmatprep.subr.bf16.mxu0 %v6084_v6  ;;  %v6168_v5 = vld [vmem:[%s7569_s7 + $0x44c] ss:$16 sps:$4 sm:$0xff]   ;;  %v6166_v6 = vld [vmem:[%s7569_s7 + $0x448] ss:$16 sps:$4 sm:$0xff]  }
 0x3a3   : > { %3749 = vmatpush1.bf16.msra.mxu1 %v6079_v8  ;;  %3790 = vmatpush1.bf16.msra.mxu0 %v6082_v11  ;;  %v6171_v8 = vld [vmem:[%s7569_s7 + $0x424] ss:$16 sps:$4 sm:$0xff]   ;;  %v6174_v11 = vld [vmem:[%s7569_s7 + $0x42c] ss:$16 sps:$4 sm:$0xff]  }
 0x3a4   : > { %3928 = vmatprep.subr.bf16.mxu1 %v6087_v47  ;;  %3969 = vmatprep.subr.bf16.mxu0 %v6090_v14  ;;  %v6169_v47 = vld [vmem:[%s7569_s7 + $0x420] ss:$16 sps:$4 sm:$0xff]   ;;  %v6172_v14 = vld [vmem:[%s7569_s7 + $0x428] ss:$16 sps:$4 sm:$0xff]  }
 0x3a6   : > { %5243 = vmatmul.mubr.msk.bf16.vlgmr.msra.gmra.mxu1 %vm2191_vm1, %v3650_v18  ;;  %5244 = vmatmul.mubr.msk.bf16.vlgmr.msra.gmra.mxu0 %vm2191_vm1, %v3650_v18  ;;  %v6178_v18 = vld [vmem:[%s7569_s7 + $0x408] ss:$16 sps:$4 sm:$0xff]  }
 0x3a7   : > { %3929 = vmatpush1.bf16.msra.mxu1 %v6085_v15  ;;  %3970 = vmatpush1.bf16.msra.mxu0 %v6088_v17  ;;  %v6177_v15 = vld [vmem:[%s7569_s7 + $0x404] ss:$16 sps:$4 sm:$0xff]   ;;  %v6175_v17 = vld [vmem:[%s7569_s7 + $0x400] ss:$16 sps:$4 sm:$0xff]  }
 0x3a8   : > { %3930 = vmatprep.subr.bf16.mxu1 %v6093_v3  ;;  %3971 = vmatprep.subr.bf16.mxu0 %v6096_v7  ;;  %v4394_v3 = vrot.slane %v6998_v22, 7  ;;  %v6181_v7 = vld [vmem:[%s7571_s9 + $0x78] sm:$0xff]  }
 0x3a9   : > { %3952 = vmatprep.mubr.bf16.mxu1 %v6277_v46  ;;  %3993 = vmatprep.mubr.bf16.mxu0 %v6277_v46  ;;  %v6184_v22 = vld [vmem:[%s7571_s9 + $0xb8] sm:$0xff]  }
 0x3ab   : > { %3931 = vmatpush1.bf16.msra.mxu1 %v6091_v13  ;;  %3972 = vmatpush1.bf16.msra.mxu0 %v6094_v12  ;;  %v6182_v13 = vld [vmem:[%s7571_s9 + $0xf8] sm:$0xff]  }
 0x3ac   : > { %3932 = vmatprep.subr.bf16.mxu1 %v6099_v19  ;;  %3973 = vmatprep.subr.bf16.mxu0 %v6102_v20  ;;  %v6183_v12 = vld [vmem:[%s7571_s9 + $0x38] sm:$0xff]   ;;  %v6185_v19 = vld [vmem:[%s7571_s9 + $0x70] sm:$0xff]  }
 0x3ad   : > { %v6186_v20 = vld [vmem:[%s7571_s9 + $0xf0] sm:$0xff]  }
 0x3af   : > { %3933 = vmatpush1.bf16.msra.mxu1 %v6097_v21  ;;  %3974 = vmatpush1.bf16.msra.mxu0 %v6100_v24  ;;  %v6187_v21 = vld [vmem:[%s7571_s9 + $0x30] sm:$0xff]  }
 0x3b0   : > { %3934 = vmatprep.subr.bf16.mxu1 %v6105_v25  ;;  %3975 = vmatprep.subr.bf16.mxu0 %v6108_v26  ;;  %v6188_v24 = vld [vmem:[%s7571_s9 + $0xb0] sm:$0xff]   ;;  %v6189_v25 = vld [vmem:[%s7571_s9 + $0x68] sm:$0xff]  }
 0x3b1   : > { %v6190_v26 = vld [vmem:[%s7571_s9 + $0xe8] sm:$0xff]  }
 0x3b3   : > { %3935 = vmatpush1.bf16.msra.mxu1 %v6103_v27  ;;  %3976 = vmatpush1.bf16.msra.mxu0 %v6106_v29  ;;  %v6191_v27 = vld [vmem:[%s7571_s9 + $0x28] sm:$0xff]  }
 0x3b4   : > { %4114 = vmatprep.subr.bf16.mxu1 %v6111_v30  ;;  %4155 = vmatprep.subr.bf16.mxu0 %v6114_v42  ;;  %v6192_v29 = vld [vmem:[%s7571_s9 + $0xa8] sm:$0xff]   ;;  %v6193_v30 = vld [vmem:[%s7571_s9 + $0x60] sm:$0xff]  }
 0x3b5   : > { %v6194_v42 = vld [vmem:[%s7571_s9 + $0xe0] sm:$0xff]  }
 0x3b6   : > { %5261 = vmatmul.mubr.msk.bf16.vlgmr.msra.gmra.mxu1 %vm2191_vm1, %v3836_v32  ;;  %5262 = vmatmul.mubr.msk.bf16.vlgmr.msra.gmra.mxu0 %vm2191_vm1, %v3836_v32  ;;  %v6197_v32 = vld [vmem:[%s7571_s9 + $0x58] sm:$0xff]  }
 0x3b7   : > { %4115 = vmatpush1.bf16.msra.mxu1 %v6109_v31  ;;  %4156 = vmatpush1.bf16.msra.mxu0 %v6112_v16  ;;  %v6195_v31 = vld [vmem:[%s7571_s9 + $0x20] sm:$0xff]  }
 0x3b8   : > { %4116 = vmatprep.subr.bf16.mxu1 %v6117_v33  ;;  %4157 = vmatprep.subr.bf16.mxu0 %v6120_v34  ;;  %v6196_v16 = vld [vmem:[%s7571_s9 + $0xa0] sm:$0xff]   ;;  %v6198_v33 = vld [vmem:[%s7571_s9 + $0xd8] sm:$0xff]  }
 0x3b9   : > { %4138 = vmatprep.mubr.bf16.mxu1 %v6277_v46  ;;  %4179 = vmatprep.mubr.bf16.mxu0 %v6277_v46  ;;  %v6199_v34 = vld [vmem:[%s7571_s9 + $0x18] sm:$0xff]  }
 0x3bb   : > { %4117 = vmatpush1.bf16.msra.mxu1 %v6115_v35  ;;  %4158 = vmatpush1.bf16.msra.mxu0 %v6118_v36  ;;  %v6200_v35 = vld [vmem:[%s7571_s9 + $0x98] sm:$0xff]  }
 0x3bc   : > { %4118 = vmatprep.subr.bf16.mxu1 %v6123_v37  ;;  %4159 = vmatprep.subr.bf16.mxu0 %v6126_v38  ;;  %v6201_v38 = vld [vmem:[%s7571_s9 + $0x50] sm:$0xff]  }
 0x3bf   : > { %4119 = vmatpush1.bf16.msra.mxu1 %v6121_v39  ;;  %4160 = vmatpush1.bf16.msra.mxu0 %v6124_v40  ;;  %v6202_v39 = vld [vmem:[%s7571_s9 + $0xd0] sm:$0xff]  }
 0x3c0   : > { %4120 = vmatprep.subr.bf16.mxu1 %v6129_v43  ;;  %4161 = vmatprep.subr.bf16.mxu0 %v6132_v44  ;;  %v6203_v44 = vld [vmem:[%s7571_s9 + $0x10] sm:$0xff]  }
 0x3c3   : > { %4121 = vmatpush1.bf16.msra.mxu1 %v6127_v48  ;;  %4162 = vmatpush1.bf16.msra.mxu0 %v6130_v49  ;;  %v6204_v48 = vld [vmem:[%s7571_s9 + $0x90] sm:$0xff]  }
 0x3c4   : > { %4300 = vmatprep.subr.bf16.mxu1 %v6135_v50  ;;  %4341 = vmatprep.subr.bf16.mxu0 %v6138_v52  ;;  %v6205_v52 = vld [vmem:[%s7571_s9 + $0x48] sm:$0xff]  }
 0x3c6   : > { %5279 = vmatmul.mubr.msk.bf16.vlgmr.msra.gmra.mxu1 %vm2191_vm1, %v4022_v23  ;;  %5280 = vmatmul.mubr.msk.bf16.vlgmr.msra.gmra.mxu0 %vm2191_vm1, %v4022_v23 }
 0x3c7   : > { %4301 = vmatpush1.bf16.msra.mxu1 %v6133_v53  ;;  %4342 = vmatpush1.bf16.msra.mxu0 %v6136_v45  ;;  %v6206_v53 = vld [vmem:[%s7571_s9 + $0xc8] sm:$0xff]  }
 0x3c8   : > { %4302 = vmatprep.subr.bf16.mxu1 %v6141_v51  ;;  %4343 = vmatprep.subr.bf16.mxu0 %v6144_v54  ;;  %v6207_v51 = vld [vmem:[%s7571_s9 + $0x8] sm:$0xff]  }
 0x3c9   : > { %4324 = vmatprep.mubr.bf16.mxu1 %v6277_v46  ;;  %4365 = vmatprep.mubr.bf16.mxu0 %v6277_v46  ;;  %v6208_v54 = vld [vmem:[%s7571_s9 + $0x88] sm:$0xff]  }
 0x3cb   : > { %4303 = vmatpush1.bf16.msra.mxu1 %v6139_v55  ;;  %4344 = vmatpush1.bf16.msra.mxu0 %v6142_v56  ;;  %v6209_v55 = vld [vmem:[%s7571_s9 + $0x40] sm:$0xff]  }
 0x3cc   : > { %4304 = vmatprep.subr.bf16.mxu1 %v6147_v57  ;;  %4345 = vmatprep.subr.bf16.mxu0 %v6150_v28  ;;  %v6210_v56 = vld [vmem:[%s7571_s9 + $0xc0] sm:$0xff]  }
 0x3cd   : > { %v6211_v57 = vld [vmem:[%s7571_s9] sm:$0xff]  }
 0x3ce   : > { %v6212_v28 = vld [vmem:[%s7571_s9 + $0x80] sm:$0xff]  }
 0x3cf   : > { %4305 = vmatpush1.bf16.msra.mxu1 %v6145_v58  ;;  %4346 = vmatpush1.bf16.msra.mxu0 %v6148_v59 }
 0x3d0   : > { %4306 = vmatprep.subr.bf16.mxu1 %v6153_v60  ;;  %4347 = vmatprep.subr.bf16.mxu0 %v6156_v61 }
 0x3d3   : > { %4307 = vmatpush1.bf16.msra.mxu1 %v6151_v41  ;;  %4348 = vmatpush1.bf16.msra.mxu0 %v6154_v62 }
 0x3d4   : > { %4486 = vmatprep.subr.bf16.mxu1 %v6159_v10  ;;  %4527 = vmatprep.subr.bf16.mxu0 %v6162_v63 }
 0x3d6   : > { %5297 = vmatmul.mubr.msk.bf16.vlgmr.msra.gmra.mxu1 %vm2191_vm1, %v4208_v2  ;;  %5298 = vmatmul.mubr.msk.bf16.vlgmr.msra.gmra.mxu0 %vm2191_vm1, %v4208_v2 }
 0x3d7   : > { %4487 = vmatpush1.bf16.msra.mxu1 %v6157_v0  ;;  %4528 = vmatpush1.bf16.msra.mxu0 %v6160_v1 }
 0x3d8   : > { %4488 = vmatprep.subr.bf16.mxu1 %v6165_v4  ;;  %4529 = vmatprep.subr.bf16.mxu0 %v6168_v5 }
 0x3d9   : > { %4510 = vmatprep.mubr.bf16.mxu1 %v6277_v46  ;;  %4551 = vmatprep.mubr.bf16.mxu0 %v6277_v46  ;;  %v6180_v46 = vld [vmem:[%s7569_s7 + $0x40c] ss:$16 sps:$4 sm:$0xff]  }
 0x3db   : > { %4489 = vmatpush1.bf16.msra.mxu1 %v6163_v9  ;;  %4530 = vmatpush1.bf16.msra.mxu0 %v6166_v6 }
 0x3dc   : > { %4490 = vmatprep.subr.bf16.mxu1 %v6171_v8  ;;  %4531 = vmatprep.subr.bf16.mxu0 %v6174_v11 }
 0x3df   : > { %4491 = vmatpush1.bf16.msra.mxu1 %v6169_v47  ;;  %4532 = vmatpush1.bf16.msra.mxu0 %v6172_v14 }
 0x3e0   : > { %4492 = vmatprep.subr.bf16.mxu1 %v6177_v15  ;;  %4533 = vmatprep.subr.bf16.mxu0 %v6180_v46 }
 0x3e3   : > { %4493 = vmatpush1.bf16.msra.mxu1 %v6175_v17  ;;  %4534 = vmatpush1.bf16.msra.mxu0 %v6178_v18 }
 0x3e4   : > { %5531 = vmatprep.subr.bf16.mxu1 %v6181_v7  ;;  %5553 = vmatprep.subr.bf16.mxu0 %v6182_v13 }
 0x3e6   : > { %5315 = vmatmul.mubr.msk.bf16.vlgmr.msra.gmra.mxu1 %vm2191_vm1, %v4394_v3  ;;  %5316 = vmatmul.mubr.msk.bf16.vlgmr.msra.gmra.mxu0 %vm2191_vm1, %v4394_v3 }
 0x3e7   : > { %5532 = vmatpush3.bf16.msra.mxu1 %v6183_v12  ;;  %5554 = vmatpush3.bf16.msra.mxu0 %v6184_v22 }
 0x3e8   : > { %5533 = vmatprep.subr.bf16.mxu1 %v6185_v19  ;;  %5555 = vmatprep.subr.bf16.mxu0 %v6186_v20 }
 0x3eb   : > { %5534 = vmatpush3.bf16.msra.mxu1 %v6187_v21  ;;  %5556 = vmatpush3.bf16.msra.mxu0 %v6188_v24 }
 0x3ec   : > { %5535 = vmatprep.subr.bf16.mxu1 %v6189_v25  ;;  %5557 = vmatprep.subr.bf16.mxu0 %v6190_v26 }
 0x3ef   : > { %5536 = vmatpush3.bf16.msra.mxu1 %v6191_v27  ;;  %5558 = vmatpush3.bf16.msra.mxu0 %v6192_v29 }
 0x3f0   : > { %5537 = vmatprep.subr.bf16.mxu1 %v6193_v30  ;;  %5559 = vmatprep.subr.bf16.mxu0 %v6194_v42 }
 0x3f3   : > { %5538 = vmatpush3.bf16.msra.mxu1 %v6195_v31  ;;  %5560 = vmatpush3.bf16.msra.mxu0 %v6196_v16 }
 0x3f4   : > { %5539 = vmatprep.subr.bf16.mxu1 %v6197_v32  ;;  %5561 = vmatprep.subr.bf16.mxu0 %v6198_v33 }
 0x3f7   : > { %5540 = vmatpush3.bf16.msra.mxu1 %v6199_v34  ;;  %5562 = vmatpush3.bf16.msra.mxu0 %v6200_v35 }
 0x3f8   : > { %5541 = vmatprep.subr.bf16.mxu1 %v6201_v38  ;;  %5563 = vmatprep.subr.bf16.mxu0 %v6202_v39 }
 0x3fb   : > { %5542 = vmatpush3.bf16.msra.mxu1 %v6203_v44  ;;  %5564 = vmatpush3.bf16.msra.mxu0 %v6204_v48 }
 0x3fc   : > { %5543 = vmatprep.subr.bf16.mxu1 %v6205_v52  ;;  %5565 = vmatprep.subr.bf16.mxu0 %v6206_v53 }
 0x3ff   : > { %5544 = vmatpush3.bf16.msra.mxu1 %v6207_v51  ;;  %5566 = vmatpush3.bf16.msra.mxu0 %v6208_v54 }
 0x400   : > { %5545 = vmatprep.subr.bf16.mxu1 %v6209_v55  ;;  %5567 = vmatprep.subr.bf16.mxu0 %v6210_v56 }
 0x403   : > { %5546 = vmatpush3.bf16.msra.mxu1 %v6211_v57  ;;  %5568 = vmatpush3.bf16.msra.mxu0 %v6212_v28 }
 0x426   : > { %v3049_v36 = vpop.f32.mrf.mxu1  ;;  %v3090_v37 = vpop.f32.mrf.mxu0 }
 0x428   : > { %v3051_v40 = vpop.f32.mrf.mxu1  ;;  %v3092_v43 = vpop.f32.mrf.mxu0 }
 0x42a   : > { %v3053_v49 = vpop.f32.mrf.mxu1  ;;  %v3094_v50 = vpop.f32.mrf.mxu0 }
 0x42c   : > { %v3054_v45 = vpop.f32.mrf.mxu1  ;;  %v3095_v23 = vpop.f32.mrf.mxu0 }
 0x436   : > { %v3213_v58 = vpop.f32.mrf.mxu1  ;;  %v3254_v59 = vpop.f32.mrf.mxu0 }
 0x437   : > { %v3214_v60 = vadd.f32 %v3213_v58, %v3049_v36  ;;  %v3255_v61 = vadd.f32 %v3254_v59, %v3090_v37  ;;  %v4566_v58 = vlaneseq }
 0x438   : > { %v3215_v41 = vpop.f32.mrf.mxu1  ;;  %v3256_v62 = vpop.f32.mrf.mxu0 }
 0x439   : > { %v3216_v10 = vadd.f32 %v3215_v41, %v3051_v40  ;;  %v3257_v63 = vadd.f32 %v3256_v62, %v3092_v43  ;;  %v4567_v62 = vshrl.u32 %v4566_v58, 7 }
 0x43a   : > { %v3217_v0 = vpop.f32.mrf.mxu1  ;;  %v3258_v1 = vpop.f32.mrf.mxu0 }
 0x43b   : > { %v4568_v0 = vsub.s32 0, %v4567_v62  ;;  %v4576_v1 = vsub.s32 2, %v4567_v62 }
 0x43c   : > { %v3218_v2 = vpop.f32.mrf.mxu1  ;;  %v3259_v4 = vpop.f32.mrf.mxu0 }
 0x446   : > { %v3396_v5 = vpop.f32.mrf.mxu1  ;;  %v3437_v9 = vpop.f32.mrf.mxu0 }
 0x447   : > { %v3444_v6 = vadd.f32 %v3396_v5, %v3214_v60  ;;  %v3446_v8 = vadd.f32 %v3437_v9, %v3255_v61 }
 0x448   : > { %v3398_v11 = vpop.f32.mrf.mxu1  ;;  %v3439_v47 = vpop.f32.mrf.mxu0 }
 0x449   : > { %v3445_v14 = vadd.f32 %v3398_v11, %v3216_v10  ;;  %v3447_v15 = vadd.f32 %v3439_v47, %v3257_v63  ;;  %v4580_v11 = vsub.s32 3, %v4567_v62 }
 0x44a   : > { %v3400_v46 = vpop.f32.mrf.mxu1  ;;  %v3441_v17 = vpop.f32.mrf.mxu0 }
 0x44c   : > { %v3401_v18 = vpop.f32.mrf.mxu1  ;;  %v3442_v3 = vpop.f32.mrf.mxu0 }
 0x456   : > { %v3582_v7 = vpop.f32.mrf.mxu1  ;;  %v3623_v13 = vpop.f32.mrf.mxu0 }
 0x457   : > { %v3630_v12 = vadd.f32 %v3582_v7, %v3444_v6  ;;  %v3632_v22 = vadd.f32 %v3623_v13, %v3446_v8  ;;  %v4564_v6 = vld [vmem:[%s7570_s8] sm:$0xf]  ;;  %v4572_v8 = vsub.s32 1, %v4567_v62 }
 0x458   : > { %v3584_v19 = vpop.f32.mrf.mxu1  ;;  %v3625_v20 = vpop.f32.mrf.mxu0  ;;  %v4569_v17 = vrot.slane %v4564_v6, %v4568_v0  ;;  %v4577_v18 = vrot.slane %v4564_v6, %v4576_v1 }
 0x459   : > { %v3631_v21 = vadd.f32 %v3584_v19, %v3445_v14  ;;  %v3633_v24 = vadd.f32 %v3625_v20, %v3447_v15  ;;  %v4573_v20 = vrot.slane %v4564_v6, %v4572_v8 }
 0x45a   : > { %v3586_v25 = vpop.f32.mrf.mxu1  ;;  %v3627_v26 = vpop.f32.mrf.mxu0 }
 0x45c   : > { %v3587_v27 = vpop.f32.mrf.mxu1  ;;  %v3628_v29 = vpop.f32.mrf.mxu0 }
 0x466   : > { %v3768_v30 = vpop.f32.mrf.mxu1  ;;  %v3809_v42 = vpop.f32.mrf.mxu0 }
 0x467   : > { %v3816_v10 = vadd.f32 %v3768_v30, %v3630_v12  ;;  %v3818_v63 = vadd.f32 %v3809_v42, %v3632_v22 }
 0x468   : > { %v3770_v31 = vpop.f32.mrf.mxu1  ;;  %v3811_v16 = vpop.f32.mrf.mxu0 }
 0x469   : > { %v3817_v2 = vadd.f32 %v3770_v31, %v3631_v21  ;;  %v3819_v4 = vadd.f32 %v3811_v16, %v3633_v24  ;;  %v4581_v21 = vrot.slane %v4564_v6, %v4580_v11 }
 0x46a   : > { %v3772_v32 = vpop.f32.mrf.mxu1  ;;  %v3813_v33 = vpop.f32.mrf.mxu0 }
 0x46c   : > { %v3773_v34 = vpop.f32.mrf.mxu1  ;;  %v3814_v35 = vpop.f32.mrf.mxu0 }
 0x476   : > { %v3954_v36 = vpop.f32.mrf.mxu1  ;;  %v3995_v37 = vpop.f32.mrf.mxu0 }
 0x477   : > { %v4002_v5 = vadd.f32 %v3954_v36, %v3816_v10  ;;  %v4004_v9 = vadd.f32 %v3995_v37, %v3818_v63 }
 0x478   : > { %v3956_v38 = vpop.f32.mrf.mxu1  ;;  %v3997_v39 = vpop.f32.mrf.mxu0 }
 0x479   : > { %v4003_v47 = vadd.f32 %v3956_v38, %v3817_v2  ;;  %v4005_v14 = vadd.f32 %v3997_v39, %v3819_v4 }
 0x47a   : > { %v3958_v40 = vpop.f32.mrf.mxu1  ;;  %v3999_v43 = vpop.f32.mrf.mxu0 }
 0x47c   : > { %v3959_v44 = vpop.f32.mrf.mxu1  ;;  %v4000_v48 = vpop.f32.mrf.mxu0 }
 0x486   : > { %v4140_v49 = vpop.f32.mrf.mxu1  ;;  %v4181_v50 = vpop.f32.mrf.mxu0 }
 0x487   : > { %v4188_v15 = vadd.f32 %v4140_v49, %v4002_v5  ;;  %v4190_v46 = vadd.f32 %v4181_v50, %v4004_v9 }
 0x488   : > { %v4142_v52 = vpop.f32.mrf.mxu1  ;;  %v4183_v53 = vpop.f32.mrf.mxu0 }
 0x489   : > { %v4189_v3 = vadd.f32 %v4142_v52, %v4003_v47  ;;  %v4191_v7 = vadd.f32 %v4183_v53, %v4005_v14 }
 0x48a   : > { %v4144_v45 = vpop.f32.mrf.mxu1  ;;  %v4185_v23 = vpop.f32.mrf.mxu0 }
 0x48b   : > { %v4662_v23 = vld [vmem:[%s7572_s10] sm:$0x1] }
 0x48c   : > { %v4145_v51 = vpop.f32.mrf.mxu1  ;;  %v4186_v54 = vpop.f32.mrf.mxu0 }
 0x496   : > { %v4326_v55 = vpop.f32.mrf.mxu1  ;;  %v4367_v56 = vpop.f32.mrf.mxu0 }
 0x497   : > { %v4374_v13 = vadd.f32 %v4326_v55, %v4188_v15  ;;  %v4376_v12 = vadd.f32 %v4367_v56, %v4190_v46 }
 0x498   : > { %v4328_v57 = vpop.f32.mrf.mxu1  ;;  %v4369_v28 = vpop.f32.mrf.mxu0 }
 0x499   : > { %v4375_v24 = vadd.f32 %v4328_v57, %v4189_v3  ;;  %v4377_v25 = vadd.f32 %v4369_v28, %v4191_v7 }
 0x49a   : > { %v4330_v59 = vpop.f32.mrf.mxu1  ;;  %v4371_v60 = vpop.f32.mrf.mxu0 }
 0x49c   : > { %v4331_v61 = vpop.f32.mrf.mxu1  ;;  %v4372_v41 = vpop.f32.mrf.mxu0 }
 0x4a6   : > { %v4512_v22 = vpop.f32.mrf.mxu1  ;;  %v4553_v19 = vpop.f32.mrf.mxu0 }
 0x4a7   : > { %v4560_v26 = vadd.f32 %v4512_v22, %v4374_v13  ;;  %v4562_v27 = vadd.f32 %v4553_v19, %v4376_v12 }
 0x4a8   : > { %v4514_v29 = vpop.f32.mrf.mxu1  ;;  %v4555_v30 = vpop.f32.mrf.mxu0 }
 0x4a9   : > { %v4586_v42 = vadd.f32 %v4569_v17, %v4560_v26  ;;  %v4588_v31 = vadd.f32 %v4577_v18, %v4562_v27  ;;  %v4561_v16 = vadd.f32 %v4514_v29, %v4375_v24  ;;  %v4563_v32 = vadd.f32 %v4555_v30, %v4377_v25 }
 0x4aa   : > { %v4516_v33 = vpop.f32.mrf.mxu1  ;;  %v4557_v34 = vpop.f32.mrf.mxu0 }
 0x4ab   : > { %v4587_v35 = vadd.f32 %v4573_v20, %v4561_v16  ;;  %v4589_v36 = vadd.f32 %v4581_v21, %v4563_v32  ;;  %v4590_v37 = vmax.f32 %v4586_v42, 0.0  ;;  %v4592_v38 = vmax.f32 %v4588_v31, 0.0 }
 0x4ac   : > { %v4517_v39 = vpop.f32.mrf.mxu1  ;;  %v4558_v40 = vpop.f32.mrf.mxu0 }
 0x4ad   : > { %v4591_v43 = vmax.f32 %v4587_v35, 0.0  ;;  %v4593_v44 = vmax.f32 %v4589_v36, 0.0  ;;  %v4594_v50 = vpack.c.bf16 %v4590_v37, %v4590_v37  ;;  %v4596_v52 = vpack.c.bf16 %v4592_v38, %v4592_v38 }
 0x4af   : > { %v4595_v48 = vpack.c.bf16 %v4591_v43, %v4591_v43  ;;  %v4597_v49 = vpack.c.bf16 %v4593_v44, %v4593_v44 }
 0x4b1   : > { %4887 = vmatprep.mubr.bf16.mxu1 %v4595_v48  ;;  %4927 = vmatprep.mubr.bf16.mxu0 %v4597_v49 }
 0x4b2   : > { %4888 = vmatmul.mubr.bf16.vlgmr.msra.gmra.mxu1 %v4594_v50  ;;  %4928 = vmatmul.mubr.bf16.vlgmr.msra.gmra.mxu0 %v4596_v52 }
 0x572   : > { %v5547_v53 = vpop.f32.mrf.mxu1  ;;  %v5569_v45 = vpop.f32.mrf.mxu0 }
 0x574   : > { %v5548_v51 = vpop.f32.mrf.mxu1  ;;  %v5570_v54 = vpop.f32.mrf.mxu0 }
 0x575   : > { %v5549_v55 = vadd.f32 %v5548_v51, %v5547_v53  ;;  %v5571_v58 = vadd.f32 %v5570_v54, %v5569_v45 }
 0x576   : > { %v5550_v56 = vpop.f32.mrf.mxu1  ;;  %v5572_v57 = vpop.f32.mrf.mxu0 }
 0x577   : > { %v4890_v28 = vadd.f32 %v5549_v55, %v4662_v23 }
 0x578   : > { %v5551_v59 = vpop.f32.mrf.mxu1  ;;  %v5573_v60 = vpop.f32.mrf.mxu0 }
 0x579   : > { %v4930_v61 = vadd.f32 %v5571_v58, %v4890_v28 }
 0x57b   : > { %4935 = vst [vmem:[%s378_s25] sm:$0x1] %v4930_v61 }
 0x57c   : > { %6226 = shalt.err (!%p6223_p3)
}
 0x57d   : > { %s6227_s24 = scalar_lea.hbm %s4947_s14, 16  ;;  %s6231_s25 = scalar_lea.hbm %s7573_s11, 32 }
 0x57e   : > { %p6228_p4 = scmp.ne.s32.totalorder %s4947_s14, %s6227_s24  ;;  %p6232_p9 = scmp.lt.s32.totalorder %s4947_s14, %s7573_s11 }
 0x57f   : > { %p6233_p10 = scmp.lt.s32.totalorder %s6231_s25, %s6227_s24 }
 0x580   : > { %p6229_p7 = pnand %p6228_p4, %p6377_p5 }
 0x581   : > { %p6234_p11 = por %p6233_p10, %p6232_p9 }
 0x582   : > { %p6230_p8 = pneg %p6229_p7 }
 0x584   : > { %p6235_p12 = pnand %p6234_p11, %p6230_p8 }
 0x586   : > { %6238 = shalt.err (!%p6235_p12)
}
 0x587   : > { %5812 = dma.vmem_to_hbm [thread:$0]  (%p6377_p5), %s4950_s12, 16, %s4947_s14, %s4937_s16  }
 0x588 PF: > { %p5818_p13 = scmp.ge.s32.totalorder %s6273_s20, 2  ;;  %s4961_s22 = sand.u32 1, %s6261_s17  }
 0x589   : > { %s4962_s21 = scalar_lea.sflag [#allocation3], %s4961_s22 }
 0x58a   : > { %p5815_p0 = pnand %p5818_p13, %p6381_p6 }
 0x58c   : > { %p5816_p1 = pneg %p5815_p0 }
 0x58e   : > { %6256 = dma.done.wait (%p5816_p1), %s4962_s21, 16  }
 0x58f   : > { %6258 = vsyncadd (%p5816_p1), %s4962_s21, 4294967280  ;;  %s7579_s19 = sld [smem:[#allocation5_spill]]  ;;  %p21_p2 = scmp.ge.s32.totalorder %s6364_s23, 4  }
 0x590   : > { %s7580_s15 = sld [smem:[#allocation6_spill]]  ;;  %s7581_s17 = smov %s6265_s18 }
 0x591   : > { %s7584_s20 = smov %s6364_s23 }
 0x592   :  { %23 = sbr.rel (!%p21_p2) target bundleno = 3 (0x3), region = 99 }
 0x595   : > { %s7582_s18 = smov %s7579_s19 }
 0x596   : > { %s7583_s19 = smov %s7580_s15 }
 0x597   :  { %4966 = vsyncpa [#allocation3], 1 }
 0x598   :  { %4968 = vsyncpa [#allocation3 + $0x1], 1 }

</bundles_post_ra>
